<compile_context>
chip_gen: v5e
topology: v5e:2x2
jax: 0.10.0
libtpu: 0.0.40
codegen_flags: <defaults>
</compile_context>

<pallas_src>
import math

import numpy as np
import jax
import jax.numpy as jnp
from jax.experimental import pallas as pl
from jax.experimental.pallas import tpu as pltpu


PARAM_ORDER = [
    "w_cp", "b_cp", "mask_token",
    "in_w", "in_b", "out_w", "out_b",
    "l1_w", "l1_b", "l2_w", "l2_b",
    "n1_w", "n1_b", "n2_w", "n2_b",
    "nf_w", "nf_b", "w_op", "b_op",
]

PER_LAYER = {"in_w", "in_b", "out_w", "out_b", "l1_w", "l1_b",
             "l2_w", "l2_b", "n1_w", "n1_b", "n2_w", "n2_b"}


def make_params(key, hidden, dp, dff, num_layers):
    """Weights stored pre-transposed (in_features, out_features), matmul weights in bf16."""
    ks = jax.random.split(key, 19)
    f32 = jnp.float32

    def w(k, shape, scale=0.02, dtype=jnp.bfloat16):
        return (scale * jax.random.normal(k, shape, f32)).astype(dtype)

    return dict(
        w_cp=w(ks[0], (hidden, dp)),
        b_cp=w(ks[1], (1, dp), 0.01, f32),
        mask_token=w(ks[2], (1, dp), 0.02, f32),
        in_w=w(ks[3], (num_layers, dp, 3 * dp)),
        in_b=w(ks[4], (num_layers, 1, 3 * dp), 0.01, f32),
        out_w=w(ks[5], (num_layers, dp, dp)),
        out_b=w(ks[6], (num_layers, 1, dp), 0.01, f32),
        l1_w=w(ks[7], (num_layers, dp, dff)),
        l1_b=w(ks[8], (num_layers, 1, dff), 0.01, f32),
        l2_w=w(ks[9], (num_layers, dff, dp)),
        l2_b=w(ks[10], (num_layers, 1, dp), 0.01, f32),
        n1_w=1.0 + w(ks[11], (num_layers, 1, dp), 0.05, f32),
        n1_b=w(ks[12], (num_layers, 1, dp), 0.02, f32),
        n2_w=1.0 + w(ks[13], (num_layers, 1, dp), 0.05, f32),
        n2_b=w(ks[14], (num_layers, 1, dp), 0.02, f32),
        nf_w=1.0 + w(ks[15], (1, dp), 0.05, f32),
        nf_b=w(ks[16], (1, dp), 0.02, f32),
        w_op=w(ks[17], (dp, hidden)),
        b_op=w(ks[18], (1, hidden), 0.01, f32),
    )


def _nbytes(shape, dtype):
    return int(np.prod(shape)) * jnp.dtype(dtype).itemsize


def _vmem_capacity_bytes(default=64 * 1024 * 1024):
    """Physical VMEM of the current chip (64 MiB v7x, 128 MiB v5e/v6e); safe fallback."""
    try:
        cap = getattr(pltpu.get_tpu_info(), "vmem_capacity_bytes", None)
        if cap:
            return int(cap)
    except Exception:
        pass
    return default


def video_transformer_predictor(context_features, mask, params, *,
                                num_heads, num_layers, max_masked=None,
                                batch_block=None):
    B, n_ctx, hidden = context_features.shape
    dp = params["w_cp"].shape[1]
    dff = params["l1_w"].shape[2]
    head_dim = dp // num_heads
    attn_scale = 1.0 / math.sqrt(head_dim)
    eps = 1e-5

    if max_masked is None:
        # Matches PyTorch `mask.sum(1).max().item()` (host sync + one compile per
        # distinct value).  Pass a static max_masked to avoid the sync/recompile.
        max_masked = int(jnp.max(jnp.sum(mask.astype(jnp.int32), axis=1)))

    S = n_ctx + max_masked
    S_pad = ((S + 15) // 16) * 16       # multiple of 16: full bf16 sublane packing
    n_tail_rows = S_pad - n_ctx         # mask-token rows (incl. padding rows)

    # ------------- VMEM budget, batch-block (Bb) selection, vmem limit -------------
    layer_bytes = sum(_nbytes(params[k].shape[1:], params[k].dtype) for k in PER_LAYER)
    global_bytes = sum(_nbytes(params[k].shape, params[k].dtype)
                       for k in PARAM_ORDER if k not in PER_LAYER)

    def step_vmem_bytes(bb):
        n = bb * S_pad
        scratch = n * dp * 4 + n * 3 * dp * 2 + n * dp * 4        # x(f32), qkv(bf16), acc(f32)
        temps = (n * 3 * dp * 4                                    # f32 qkv before cast
                 + bb * S_pad * S_pad * (4 + 2)                    # scores f32 + P bf16 (1 head)
                 + n * head_dim * (4 + 2)                          # per-head PV output
                 + n * dff * (4 + 2)                               # MLP hidden f32 + bf16
                 + 4 * n * dp * 4)                                 # residual / LN temporaries
        io = 2 * bb * n_ctx * hidden * 4 + 2 * bb * max_masked * hidden * 4
        return 2 * layer_bytes + 2 * global_bytes + io + scratch + temps

    physical_vmem = _vmem_capacity_bytes()
    budget = int(physical_vmem * 0.85)   # leave headroom for Mosaic internal scratch

    if batch_block is None:
        batch_block = 1
        for cand in (2, 4, 8, 16):
            if cand > B or step_vmem_bytes(cand) > budget:
                break
            batch_block = cand
    Bb = max(1, min(int(batch_block), B))

    vmem_limit = int(min(budget,
                         max(32 * 1024 * 1024,
                             1.25 * step_vmem_bytes(Bb) + (8 << 20))))

    # Pad batch to a multiple of Bb (padded rows are independent garbage, sliced off).
    B_pad = ((B + Bb - 1) // Bb) * Bb
    ctx_in = context_features.astype(jnp.float32)
    if B_pad != B:
        ctx_in = jnp.concatenate(
            [ctx_in, jnp.zeros((B_pad - B, n_ctx, hidden), jnp.float32)], axis=0)

    N_rows = Bb * S_pad

    def layernorm(x, w, b):
        # Fused statistics: E[x] and E[x^2] both depend only on x (no serialized
        # (x-mu)^2 pass); pre-fold gamma * rsqrt(var + eps).
        mu = jnp.mean(x, axis=-1, keepdims=True)
        var = jnp.mean(x * x, axis=-1, keepdims=True) - mu * mu
        g = w * jax.lax.rsqrt(var + eps)
        return (x - mu) * g + b

    def gelu(x):  # exact (erf) GELU, matching torch F.gelu default
        return 0.5 * x * (1.0 + jax.lax.erf(x * (1.0 / math.sqrt(2.0))))

    def kernel(ctx_ref, wcp_ref, bcp_ref, mtok_ref,
               inw_ref, inb_ref, outw_ref, outb_ref,
               l1w_ref, l1b_ref, l2w_ref, l2b_ref,
               n1w_ref, n1b_ref, n2w_ref, n2b_ref,
               nfw_ref, nfb_ref, wop_ref, bop_ref,
               out_ref, x_ref, qkv_ref, acc_ref):
        l = pl.program_id(1)

        # ---- layer 0: build the (Bb*S_pad, dp) activation stack in VMEM ----
        @pl.when(l == 0)
        def _init():
            w_cp = wcp_ref[...]
            b_cp = bcp_ref[...]
            mtok = jnp.broadcast_to(mtok_ref[...], (n_tail_rows, dp))
            for b in range(Bb):
                r0 = b * S_pad
                ctx_b = ctx_ref[b].astype(jnp.bfloat16)          # (n_ctx, hidden)
                x_ref[r0:r0 + n_ctx, :] = (
                    jnp.dot(ctx_b, w_cp, preferred_element_type=jnp.float32) + b_cp)
                x_ref[r0 + n_ctx:r0 + S_pad, :] = mtok

        # ---- one transformer encoder layer (post-norm, MHA + GELU MLP) ----
        x = x_ref[...]                                            # (N_rows, dp) f32
        # Single fused QKV matmul over all Bb rows, stored once as bf16.
        qkv_ref[...] = (jnp.dot(x.astype(jnp.bfloat16), inw_ref[...],
                                preferred_element_type=jnp.float32)
                        + inb_ref[...]).astype(jnp.bfloat16)

        if S_pad != S:
            valid = jax.lax.broadcasted_iota(jnp.int32, (1, 1, S_pad), 2) < S
            key_bias = jnp.where(valid, 0.0, -1e30).astype(jnp.float32)

        # Attention out-projection accumulator (initialized with the output bias).
        acc_ref[...] = jnp.broadcast_to(outb_ref[...], (N_rows, dp))

        # Static Python loop over heads (static lane slices only); each iteration
        # ends in a ref accumulation, keeping a single score matrix live at a time.
        for h in range(num_heads):
            lo, hi = h * head_dim, (h + 1) * head_dim
            qh = qkv_ref[:, lo:hi].reshape(Bb, S_pad, head_dim)
            kh = qkv_ref[:, dp + lo:dp + hi].reshape(Bb, S_pad, head_dim)
            vh = qkv_ref[:, 2 * dp + lo:2 * dp + hi].reshape(Bb, S_pad, head_dim)
            # Batched over the Bb samples: no materialized transpose of K.
            s = jnp.einsum("bqd,bkd->bqk", qh, kh,
                           preferred_element_type=jnp.float32) * attn_scale
            if S_pad != S:
                s = s + key_bias                                  # mask padded keys
            s = s - jnp.max(s, axis=-1, keepdims=True)
            p = jnp.exp(s)
            p = p * pl.reciprocal(jnp.sum(p, axis=-1, keepdims=True), approx=True)
            o = jnp.einsum("bqk,bkd->bqd", p.astype(jnp.bfloat16), vh,
                           preferred_element_type=jnp.float32)    # (Bb, S_pad, hd)
            # Accumulate the head's contribution straight into the out-projection:
            # full dp-wide (lane-dense) stores, no narrow head_dim-wide writes.
            acc_ref[...] += jnp.dot(
                o.reshape(N_rows, head_dim).astype(jnp.bfloat16),
                outw_ref[lo:hi, :], preferred_element_type=jnp.float32)

        # residual + stochastic_depth(block(x) - residual) == block(x) (drop_prob=0)
        x = layernorm(x + acc_ref[...], n1w_ref[...], n1b_ref[...])

        ff = gelu(jnp.dot(x.astype(jnp.bfloat16), l1w_ref[...],
                          preferred_element_type=jnp.float32) + l1b_ref[...])
        ff = jnp.dot(ff.astype(jnp.bfloat16), l2w_ref[...],
                     preferred_element_type=jnp.float32) + l2b_ref[...]
        x = layernorm(x + ff, n2w_ref[...], n2b_ref[...])
        x_ref[...] = x

        # ---- last layer: final LayerNorm, slice masked rows, output projection ----
        @pl.when(l == num_layers - 1)
        def _finalize():
            xf = layernorm(x, nfw_ref[...], nfb_ref[...])
            w_op = wop_ref[...]
            b_op = bop_ref[...]
            for b in range(Bb):
                r0 = b * S_pad + n_ctx
                pred = xf[r0:r0 + max_masked, :].astype(jnp.bfloat16)
                out_ref[b] = (jnp.dot(pred, w_op,
                                      preferred_element_type=jnp.float32) + b_op)

    # ---- BlockSpecs: one layer's weights streamed per grid step, reused for Bb rows ----
    def global_spec(arr):
        nd = arr.ndim
        return pl.BlockSpec(arr.shape, lambda nb, l, _nd=nd: (0,) * _nd)

    def layer_spec(arr):
        bs = (None,) + tuple(arr.shape[1:])
        nz = arr.ndim - 1
        return pl.BlockSpec(bs, lambda nb, l, _nz=nz: (l,) + (0,) * _nz)

    param_args = [params[k] for k in PARAM_ORDER]
    in_specs = [pl.BlockSpec((Bb, n_ctx, hidden), lambda nb, l: (nb, 0, 0))]
    in_specs += [layer_spec(params[k]) if k in PER_LAYER else global_spec(params[k])
                 for k in PARAM_ORDER]
    out_spec = pl.BlockSpec((Bb, max_masked, hidden), lambda nb, l: (nb, 0, 0))

    out = pl.pallas_call(
        kernel,
        grid_spec=pltpu.PrefetchScalarGridSpec(
            num_scalar_prefetch=0,
            grid=(B_pad // Bb, num_layers),
            in_specs=in_specs,
            out_specs=out_spec,
            scratch_shapes=[pltpu.VMEM((N_rows, dp), jnp.float32),       # activation x
                            pltpu.VMEM((N_rows, 3 * dp), jnp.bfloat16),  # fused QKV
                            pltpu.VMEM((N_rows, dp), jnp.float32)],      # attn-out acc
        ),
        out_shape=jax.ShapeDtypeStruct((B_pad, max_masked, hidden), jnp.float32),
        compiler_params=pltpu.CompilerParams(
            # Batch-block axis parallel (megacore shards it on v7x), layer axis
            # sequential (activation scratch carried across it).
            dimension_semantics=("parallel", "arbitrary"),
            vmem_limit_bytes=vmem_limit,
        ),
    )(ctx_in, *param_args)
    return out[:B]


def reference_forward(context_features, params, max_masked, num_heads, num_layers):
    """Pure-JAX reference mirroring the kernel's bf16-matmul / f32-accumulate math."""
    B, n_ctx, hidden = context_features.shape
    dp = params["w_cp"].shape[1]
    hd = dp // num_heads
    scale = 1.0 / math.sqrt(hd)
    eps = 1e-5
    f32 = jnp.float32

    def mm(x, w):
        return jnp.dot(x.astype(jnp.bfloat16), w.astype(jnp.bfloat16),
                       preferred_element_type=f32)

    def ln(x, w, b):
        mu = x.mean(-1, keepdims=True)
        var = ((x - mu) ** 2).mean(-1, keepdims=True)
        return (x - mu) * jax.lax.rsqrt(var + eps) * w + b

    def gelu(x):
        return 0.5 * x * (1.0 + jax.lax.erf(x / math.sqrt(2.0)))

    x = mm(context_features, params["w_cp"]) + params["b_cp"]
    mt = jnp.broadcast_to(params["mask_token"][None], (B, max_masked, dp)).astype(f32)
    x = jnp.concatenate([x, mt], axis=1)
    S = n_ctx + max_masked
    for l in range(num_layers):
        qkv = mm(x, params["in_w"][l]) + params["in_b"][l]
        q, k, v = jnp.split(qkv.astype(jnp.bfloat16), 3, axis=-1)
        q = q.reshape(B, S, num_heads, hd).transpose(0, 2, 1, 3)
        k = k.reshape(B, S, num_heads, hd).transpose(0, 2, 1, 3)
        v = v.reshape(B, S, num_heads, hd).transpose(0, 2, 1, 3)
        s = jnp.einsum("bhqd,bhkd->bhqk", q, k, preferred_element_type=f32) * scale
        p = jax.nn.softmax(s, axis=-1)
        a = jnp.einsum("bhqk,bhkd->bhqd", p.astype(jnp.bfloat16), v,
                       preferred_element_type=f32)
        a = a.transpose(0, 2, 1, 3).reshape(B, S, dp)
        a = mm(a, params["out_w"][l]) + params["out_b"][l]
        x = ln(x + a, params["n1_w"][l], params["n1_b"][l])
        ff = gelu(mm(x, params["l1_w"][l]) + params["l1_b"][l])
        ff = mm(ff, params["l2_w"][l]) + params["l2_b"][l]
        x = ln(x + ff, params["n2_w"][l], params["n2_b"][l])
    x = ln(x, params["nf_w"], params["nf_b"])
    return mm(x[:, n_ctx:, :], params["w_op"]) + params["b_op"]


if __name__ == "__main__":
    key = jax.random.PRNGKey(0)
    k_ctx, k_mask, k_par = jax.random.split(key, 3)

    # Small shapes consistent with the module (hidden_size, predictor_hidden_size, heads | D).
    B, n_ctx, num_patches = 2, 8, 16
    hidden, dp, num_heads, num_layers, mlp_ratio = 32, 32, 4, 2, 4.0
    dff = int(dp * mlp_ratio)

    context_features = jax.random.normal(k_ctx, (B, n_ctx, hidden), jnp.float32)
    mask = jax.random.uniform(k_mask, (B, num_patches)) < 0.3
    mask = mask.at[:, 0].set(True)  # guarantee max_masked >= 1

    params = make_params(k_par, hidden, dp, dff, num_layers)

    # Resolve the data-dependent output length ONCE (mirrors torch .item()); it is
    # passed as a static argument so the pallas_call compiles a single time.
    max_masked = int(jnp.max(jnp.sum(mask.astype(jnp.int32), axis=1)))

    out = video_transformer_predictor(
        context_features, mask, params,
        num_heads=num_heads, num_layers=num_layers, max_masked=max_masked)
    out = jax.block_until_ready(out)

    ref = reference_forward(context_features, params, max_masked, num_heads, num_layers)
    assert out.shape == (B, max_masked, hidden), out.shape
    np.testing.assert_allclose(np.asarray(out), np.asarray(ref), atol=3e-3, rtol=3e-2)
    print("KERNEL_OK")
</pallas_src>

<mosaic_0001>
module attributes {stable_mosaic.version = 11 : i64} {
  func.func @kernel(%arg0: i32, %arg1: i32, %arg2: memref<2x8x32xf32, #tpu.memory_space<vmem>>, %arg3: memref<32x32xbf16, #tpu.memory_space<vmem>>, %arg4: memref<1x32xf32, #tpu.memory_space<vmem>>, %arg5: memref<1x32xf32, #tpu.memory_space<vmem>>, %arg6: memref<1x32x96xbf16, #tpu.memory_space<vmem>>, %arg7: memref<1x1x96xf32, #tpu.memory_space<vmem>>, %arg8: memref<1x32x32xbf16, #tpu.memory_space<vmem>>, %arg9: memref<1x1x32xf32, #tpu.memory_space<vmem>>, %arg10: memref<1x32x128xbf16, #tpu.memory_space<vmem>>, %arg11: memref<1x1x128xf32, #tpu.memory_space<vmem>>, %arg12: memref<1x128x32xbf16, #tpu.memory_space<vmem>>, %arg13: memref<1x1x32xf32, #tpu.memory_space<vmem>>, %arg14: memref<1x1x32xf32, #tpu.memory_space<vmem>>, %arg15: memref<1x1x32xf32, #tpu.memory_space<vmem>>, %arg16: memref<1x1x32xf32, #tpu.memory_space<vmem>>, %arg17: memref<1x1x32xf32, #tpu.memory_space<vmem>>, %arg18: memref<1x32xf32, #tpu.memory_space<vmem>>, %arg19: memref<1x32xf32, #tpu.memory_space<vmem>>, %arg20: memref<32x32xbf16, #tpu.memory_space<vmem>>, %arg21: memref<1x32xf32, #tpu.memory_space<vmem>>, %arg22: memref<2x8x32xf32, #tpu.memory_space<vmem>>, %arg23: memref<32x32xf32, #tpu.memory_space<vmem>>, %arg24: memref<32x96xbf16, #tpu.memory_space<vmem>>, %arg25: memref<32x32xf32, #tpu.memory_space<vmem>>) attributes {dimension_semantics = [#tpu.dimension_semantics<parallel>, #tpu.dimension_semantics<arbitrary>], iteration_bounds = array<i64: 1, 2>, scalar_prefetch = 0 : i64, scratch_operands = 3 : i64, tpu.core_type = #tpu.core_type<tc>, window_params = [{transform_indices = @transform_0, window_bounds = array<i64: 2, 8, 32>}, {pipeline_mode = #tpu.pipeline_mode<synchronous>, transform_indices = @transform_1, window_bounds = array<i64: 32, 32>}, {pipeline_mode = #tpu.pipeline_mode<synchronous>, transform_indices = @transform_2, window_bounds = array<i64: 1, 32>}, {pipeline_mode = #tpu.pipeline_mode<synchronous>, transform_indices = @transform_3, window_bounds = array<i64: 1, 32>}, {transform_indices = @transform_4, window_bounds = array<i64: 1, 32, 96>}, {transform_indices = @transform_5, window_bounds = array<i64: 1, 1, 96>}, {transform_indices = @transform_6, window_bounds = array<i64: 1, 32, 32>}, {transform_indices = @transform_7, window_bounds = array<i64: 1, 1, 32>}, {transform_indices = @transform_8, window_bounds = array<i64: 1, 32, 128>}, {transform_indices = @transform_9, window_bounds = array<i64: 1, 1, 128>}, {transform_indices = @transform_10, window_bounds = array<i64: 1, 128, 32>}, {transform_indices = @transform_11, window_bounds = array<i64: 1, 1, 32>}, {transform_indices = @transform_12, window_bounds = array<i64: 1, 1, 32>}, {transform_indices = @transform_13, window_bounds = array<i64: 1, 1, 32>}, {transform_indices = @transform_14, window_bounds = array<i64: 1, 1, 32>}, {transform_indices = @transform_15, window_bounds = array<i64: 1, 1, 32>}, {pipeline_mode = #tpu.pipeline_mode<synchronous>, transform_indices = @transform_16, window_bounds = array<i64: 1, 32>}, {pipeline_mode = #tpu.pipeline_mode<synchronous>, transform_indices = @transform_17, window_bounds = array<i64: 1, 32>}, {pipeline_mode = #tpu.pipeline_mode<synchronous>, transform_indices = @transform_18, window_bounds = array<i64: 32, 32>}, {pipeline_mode = #tpu.pipeline_mode<synchronous>, transform_indices = @transform_19, window_bounds = array<i64: 1, 32>}, {transform_indices = @transform_20, window_bounds = array<i64: 2, 8, 32>}]} {
    %c0_i32 = arith.constant 0 : i32
    %0 = arith.cmpi eq, %arg1, %c0_i32 : i32
    %1 = arith.extui %0 : i1 to i32
    %c0_i32_0 = arith.constant 0 : i32
    %2 = arith.cmpi ne, %1, %c0_i32_0 : i32
    scf.if %2 {
      %c0_124 = arith.constant 0 : index
      %c0_125 = arith.constant 0 : index
      %218 = vector.load %arg3[%c0_124, %c0_125] : memref<32x32xbf16, #tpu.memory_space<vmem>>, vector<32x32xbf16>
      %c0_126 = arith.constant 0 : index
      %c0_127 = arith.constant 0 : index
      %219 = vector.load %arg4[%c0_126, %c0_127] : memref<1x32xf32, #tpu.memory_space<vmem>>, vector<1x32xf32>
      %c0_128 = arith.constant 0 : index
      %c0_129 = arith.constant 0 : index
      %220 = vector.load %arg5[%c0_128, %c0_129] : memref<1x32xf32, #tpu.memory_space<vmem>>, vector<1x32xf32>
      %221 = vector.shape_cast %220 : vector<1x32xf32> to vector<1x32xf32>
      %222 = vector.broadcast %221 : vector<1x32xf32> to vector<8x32xf32>
      %c0_130 = arith.constant 0 : index
      %c0_131 = arith.constant 0 : index
      %c0_132 = arith.constant 0 : index
      %223 = vector.load %arg2[%c0_130, %c0_131, %c0_132] : memref<2x8x32xf32, #tpu.memory_space<vmem>>, vector<1x8x32xf32>
      %224 = vector.shape_cast %223 : vector<1x8x32xf32> to vector<8x32xf32>
      %225 = arith.truncf %224 : vector<8x32xf32> to vector<8x32xbf16>
      %cst_133 = arith.constant dense<0.000000e+00> : vector<8x32xf32>
      %226 = tpu.matmul %225, %218, %cst_133 {dimension_numbers = #tpu.dot_dimension_numbers<[1], [0], [0], [1], [0, 0, 1, 1], [], []>} : vector<8x32xbf16>, vector<32x32xbf16>, vector<8x32xf32> -> vector<8x32xf32>
      %227 = vector.broadcast %219 : vector<1x32xf32> to vector<8x32xf32>
      %228 = arith.addf %226, %227 : vector<8x32xf32>
      %c0_134 = arith.constant 0 : index
      %c0_135 = arith.constant 0 : index
      %229 = vector.load %arg23[%c0_134, %c0_135] : memref<32x32xf32, #tpu.memory_space<vmem>>, vector<8x32xf32>
      tpu.vector_store %arg23[%c0_134, %c0_135], %228 {strides = array<i32>} : memref<32x32xf32, #tpu.memory_space<vmem>>, vector<8x32xf32>,
      %c8_136 = arith.constant 8 : index
      %c0_137 = arith.constant 0 : index
      %230 = vector.load %arg23[%c8_136, %c0_137] : memref<32x32xf32, #tpu.memory_space<vmem>>, vector<8x32xf32>
      tpu.vector_store %arg23[%c8_136, %c0_137], %222 {strides = array<i32>} : memref<32x32xf32, #tpu.memory_space<vmem>>, vector<8x32xf32>,
      %c1 = arith.constant 1 : index
      %c0_138 = arith.constant 0 : index
      %c0_139 = arith.constant 0 : index
      %231 = vector.load %arg2[%c1, %c0_138, %c0_139] : memref<2x8x32xf32, #tpu.memory_space<vmem>>, vector<1x8x32xf32>
      %232 = vector.shape_cast %231 : vector<1x8x32xf32> to vector<8x32xf32>
      %233 = arith.truncf %232 : vector<8x32xf32> to vector<8x32xbf16>
      %cst_140 = arith.constant dense<0.000000e+00> : vector<8x32xf32>
      %234 = tpu.matmul %233, %218, %cst_140 {dimension_numbers = #tpu.dot_dimension_numbers<[1], [0], [0], [1], [0, 0, 1, 1], [], []>} : vector<8x32xbf16>, vector<32x32xbf16>, vector<8x32xf32> -> vector<8x32xf32>
      %235 = vector.broadcast %219 : vector<1x32xf32> to vector<8x32xf32>
      %236 = arith.addf %234, %235 : vector<8x32xf32>
      %c16_141 = arith.constant 16 : index
      %c0_142 = arith.constant 0 : index
      %237 = vector.load %arg23[%c16_141, %c0_142] : memref<32x32xf32, #tpu.memory_space<vmem>>, vector<8x32xf32>
      tpu.vector_store %arg23[%c16_141, %c0_142], %236 {strides = array<i32>} : memref<32x32xf32, #tpu.memory_space<vmem>>, vector<8x32xf32>,
      %c24_143 = arith.constant 24 : index
      %c0_144 = arith.constant 0 : index
      %238 = vector.load %arg23[%c24_143, %c0_144] : memref<32x32xf32, #tpu.memory_space<vmem>>, vector<8x32xf32>
      tpu.vector_store %arg23[%c24_143, %c0_144], %222 {strides = array<i32>} : memref<32x32xf32, #tpu.memory_space<vmem>>, vector<8x32xf32>,
    } else {
    }
    %c0 = arith.constant 0 : index
    %c0_1 = arith.constant 0 : index
    %3 = vector.load %arg23[%c0, %c0_1] : memref<32x32xf32, #tpu.memory_space<vmem>>, vector<32x32xf32>
    %4 = arith.truncf %3 : vector<32x32xf32> to vector<32x32xbf16>
    %c0_2 = arith.constant 0 : index
    %c0_3 = arith.constant 0 : index
    %c0_4 = arith.constant 0 : index
    %5 = vector.load %arg6[%c0_2, %c0_3, %c0_4] : memref<1x32x96xbf16, #tpu.memory_space<vmem>>, vector<1x32x96xbf16>
    %6 = vector.shape_cast %5 : vector<1x32x96xbf16> to vector<32x96xbf16>
    %cst = arith.constant dense<0.000000e+00> : vector<32x96xf32>
    %7 = tpu.matmul %4, %6, %cst {dimension_numbers = #tpu.dot_dimension_numbers<[1], [0], [0], [1], [0, 0, 1, 1], [], []>} : vector<32x32xbf16>, vector<32x96xbf16>, vector<32x96xf32> -> vector<32x96xf32>
    %c0_5 = arith.constant 0 : index
    %c0_6 = arith.constant 0 : index
    %c0_7 = arith.constant 0 : index
    %8 = vector.load %arg7[%c0_5, %c0_6, %c0_7] : memref<1x1x96xf32, #tpu.memory_space<vmem>>, vector<1x1x96xf32>
    %9 = vector.shape_cast %8 : vector<1x1x96xf32> to vector<1x96xf32>
    %10 = vector.broadcast %9 : vector<1x96xf32> to vector<32x96xf32>
    %11 = arith.addf %7, %10 : vector<32x96xf32>
    %12 = arith.truncf %11 : vector<32x96xf32> to vector<32x96xbf16>
    %c0_8 = arith.constant 0 : index
    %c0_9 = arith.constant 0 : index
    %13 = vector.load %arg24[%c0_8, %c0_9] : memref<32x96xbf16, #tpu.memory_space<vmem>>, vector<32x96xbf16>
    tpu.vector_store %arg24[%c0_8, %c0_9], %12 {strides = array<i32>} : memref<32x96xbf16, #tpu.memory_space<vmem>>, vector<32x96xbf16>,
    %c0_10 = arith.constant 0 : index
    %c0_11 = arith.constant 0 : index
    %c0_12 = arith.constant 0 : index
    %14 = vector.load %arg9[%c0_10, %c0_11, %c0_12] : memref<1x1x32xf32, #tpu.memory_space<vmem>>, vector<1x1x32xf32>
    %15 = vector.shape_cast %14 : vector<1x1x32xf32> to vector<1x32xf32>
    %16 = vector.shape_cast %15 : vector<1x32xf32> to vector<1x32xf32>
    %17 = vector.broadcast %16 : vector<1x32xf32> to vector<32x32xf32>
    %c0_13 = arith.constant 0 : index
    %c0_14 = arith.constant 0 : index
    %18 = vector.load %arg25[%c0_13, %c0_14] : memref<32x32xf32, #tpu.memory_space<vmem>>, vector<32x32xf32>
    tpu.vector_store %arg25[%c0_13, %c0_14], %17 {strides = array<i32>} : memref<32x32xf32, #tpu.memory_space<vmem>>, vector<32x32xf32>,
    %c0_15 = arith.constant 0 : index
    %c0_16 = arith.constant 0 : index
    %19 = vector.load %arg24[%c0_15, %c0_16] : memref<32x96xbf16, #tpu.memory_space<vmem>>, vector<32x8xbf16>
    %20 = vector.shape_cast %19 : vector<32x8xbf16> to vector<2x16x8xbf16>
    %c0_17 = arith.constant 0 : index
    %c32 = arith.constant 32 : index
    %21 = vector.load %arg24[%c0_17, %c32] : memref<32x96xbf16, #tpu.memory_space<vmem>>, vector<32x8xbf16>
    %22 = vector.shape_cast %21 : vector<32x8xbf16> to vector<2x16x8xbf16>
    %c0_18 = arith.constant 0 : index
    %c64 = arith.constant 64 : index
    %23 = vector.load %arg24[%c0_18, %c64] : memref<32x96xbf16, #tpu.memory_space<vmem>>, vector<32x8xbf16>
    %24 = vector.shape_cast %23 : vector<32x8xbf16> to vector<2x16x8xbf16>
    "tpu.trace_start"() <{level = 10 : i32, message = "bqd,bkd->bqk"}> : () -> ()
    %cst_19 = arith.constant dense<0.000000e+00> : vector<2x16x16xf32>
    %25 = tpu.matmul %20, %22, %cst_19 {dimension_numbers = #tpu.dot_dimension_numbers<[2], [2], [1], [1], [0, 0, 0, 1, 1, 1], [0], [0]>} : vector<2x16x8xbf16>, vector<2x16x8xbf16>, vector<2x16x16xf32> -> vector<2x16x16xf32>
    "tpu.trace_stop"() : () -> ()
    %cst_20 = arith.constant 0.353553385 : f32
    %26 = vector.broadcast %cst_20 : f32 to vector<2x16x16xf32>
    %27 = arith.mulf %25, %26 : vector<2x16x16xf32>
    %cst_21 = arith.constant dense<0xFF800000> : vector<2x16xf32>
    %28 = vector.multi_reduction <maximumf>, %27, %cst_21 [2] : vector<2x16x16xf32> to vector<2x16xf32>
    %29 = vector.shape_cast %28 : vector<2x16xf32> to vector<2x16x1xf32>
    %30 = vector.broadcast %29 : vector<2x16x1xf32> to vector<2x16x16xf32>
    %31 = arith.subf %27, %30 : vector<2x16x16xf32>
    %32 = math.exp %31 : vector<2x16x16xf32>
    %cst_22 = arith.constant dense<0.000000e+00> : vector<2x16xf32>
    %33 = vector.multi_reduction <add>, %32, %cst_22 [2] : vector<2x16x16xf32> to vector<2x16xf32>
    %34 = vector.shape_cast %33 : vector<2x16xf32> to vector<2x16x1xf32>
    %35 = tpu.reciprocal %34 {approx = true} : vector<2x16x1xf32> -> vector<2x16x1xf32>
    %36 = vector.broadcast %35 : vector<2x16x1xf32> to vector<2x16x16xf32>
    %37 = arith.mulf %32, %36 : vector<2x16x16xf32>
    %38 = arith.truncf %37 : vector<2x16x16xf32> to vector<2x16x16xbf16>
    "tpu.trace_start"() <{level = 10 : i32, message = "bqk,bkd->bqd"}> : () -> ()
    %cst_23 = arith.constant dense<0.000000e+00> : vector<2x16x8xf32>
    %39 = tpu.matmul %38, %24, %cst_23 {dimension_numbers = #tpu.dot_dimension_numbers<[2], [1], [1], [2], [0, 0, 0, 1, 1, 2], [0], [0]>} : vector<2x16x16xbf16>, vector<2x16x8xbf16>, vector<2x16x8xf32> -> vector<2x16x8xf32>
    "tpu.trace_stop"() : () -> ()
    %c0_24 = arith.constant 0 : index
    %c0_25 = arith.constant 0 : index
    %40 = vector.load %arg25[%c0_24, %c0_25] : memref<32x32xf32, #tpu.memory_space<vmem>>, vector<32x32xf32>
    %41 = vector.shape_cast %39 : vector<2x16x8xf32> to vector<32x8xf32>
    %42 = arith.truncf %41 : vector<32x8xf32> to vector<32x8xbf16>
    %c0_26 = arith.constant 0 : index
    %c0_27 = arith.constant 0 : index
    %c0_28 = arith.constant 0 : index
    %43 = vector.load %arg8[%c0_26, %c0_27, %c0_28] : memref<1x32x32xbf16, #tpu.memory_space<vmem>>, vector<1x8x32xbf16>
    %44 = vector.shape_cast %43 : vector<1x8x32xbf16> to vector<8x32xbf16>
    %cst_29 = arith.constant dense<0.000000e+00> : vector<32x32xf32>
    %45 = tpu.matmul %42, %44, %cst_29 {dimension_numbers = #tpu.dot_dimension_numbers<[1], [0], [0], [1], [0, 0, 1, 1], [], []>} : vector<32x8xbf16>, vector<8x32xbf16>, vector<32x32xf32> -> vector<32x32xf32>
    %46 = arith.addf %40, %45 : vector<32x32xf32>
    %c0_30 = arith.constant 0 : index
    %c0_31 = arith.constant 0 : index
    %47 = vector.load %arg25[%c0_30, %c0_31] : memref<32x32xf32, #tpu.memory_space<vmem>>, vector<32x32xf32>
    tpu.vector_store %arg25[%c0_30, %c0_31], %46 {strides = array<i32>} : memref<32x32xf32, #tpu.memory_space<vmem>>, vector<32x32xf32>,
    %c0_32 = arith.constant 0 : index
    %c8 = arith.constant 8 : index
    %48 = vector.load %arg24[%c0_32, %c8] : memref<32x96xbf16, #tpu.memory_space<vmem>>, vector<32x8xbf16>
    %49 = vector.shape_cast %48 : vector<32x8xbf16> to vector<2x16x8xbf16>
    %c0_33 = arith.constant 0 : index
    %c40 = arith.constant 40 : index
    %50 = vector.load %arg24[%c0_33, %c40] : memref<32x96xbf16, #tpu.memory_space<vmem>>, vector<32x8xbf16>
    %51 = vector.shape_cast %50 : vector<32x8xbf16> to vector<2x16x8xbf16>
    %c0_34 = arith.constant 0 : index
    %c72 = arith.constant 72 : index
    %52 = vector.load %arg24[%c0_34, %c72] : memref<32x96xbf16, #tpu.memory_space<vmem>>, vector<32x8xbf16>
    %53 = vector.shape_cast %52 : vector<32x8xbf16> to vector<2x16x8xbf16>
    "tpu.trace_start"() <{level = 10 : i32, message = "bqd,bkd->bqk"}> : () -> ()
    %cst_35 = arith.constant dense<0.000000e+00> : vector<2x16x16xf32>
    %54 = tpu.matmul %49, %51, %cst_35 {dimension_numbers = #tpu.dot_dimension_numbers<[2], [2], [1], [1], [0, 0, 0, 1, 1, 1], [0], [0]>} : vector<2x16x8xbf16>, vector<2x16x8xbf16>, vector<2x16x16xf32> -> vector<2x16x16xf32>
    "tpu.trace_stop"() : () -> ()
    %cst_36 = arith.constant 0.353553385 : f32
    %55 = vector.broadcast %cst_36 : f32 to vector<2x16x16xf32>
    %56 = arith.mulf %54, %55 : vector<2x16x16xf32>
    %cst_37 = arith.constant dense<0xFF800000> : vector<2x16xf32>
    %57 = vector.multi_reduction <maximumf>, %56, %cst_37 [2] : vector<2x16x16xf32> to vector<2x16xf32>
    %58 = vector.shape_cast %57 : vector<2x16xf32> to vector<2x16x1xf32>
    %59 = vector.broadcast %58 : vector<2x16x1xf32> to vector<2x16x16xf32>
    %60 = arith.subf %56, %59 : vector<2x16x16xf32>
    %61 = math.exp %60 : vector<2x16x16xf32>
    %cst_38 = arith.constant dense<0.000000e+00> : vector<2x16xf32>
    %62 = vector.multi_reduction <add>, %61, %cst_38 [2] : vector<2x16x16xf32> to vector<2x16xf32>
    %63 = vector.shape_cast %62 : vector<2x16xf32> to vector<2x16x1xf32>
    %64 = tpu.reciprocal %63 {approx = true} : vector<2x16x1xf32> -> vector<2x16x1xf32>
    %65 = vector.broadcast %64 : vector<2x16x1xf32> to vector<2x16x16xf32>
    %66 = arith.mulf %61, %65 : vector<2x16x16xf32>
    %67 = arith.truncf %66 : vector<2x16x16xf32> to vector<2x16x16xbf16>
    "tpu.trace_start"() <{level = 10 : i32, message = "bqk,bkd->bqd"}> : () -> ()
    %cst_39 = arith.constant dense<0.000000e+00> : vector<2x16x8xf32>
    %68 = tpu.matmul %67, %53, %cst_39 {dimension_numbers = #tpu.dot_dimension_numbers<[2], [1], [1], [2], [0, 0, 0, 1, 1, 2], [0], [0]>} : vector<2x16x16xbf16>, vector<2x16x8xbf16>, vector<2x16x8xf32> -> vector<2x16x8xf32>
    "tpu.trace_stop"() : () -> ()
    %c0_40 = arith.constant 0 : index
    %c0_41 = arith.constant 0 : index
    %69 = vector.load %arg25[%c0_40, %c0_41] : memref<32x32xf32, #tpu.memory_space<vmem>>, vector<32x32xf32>
    %70 = vector.shape_cast %68 : vector<2x16x8xf32> to vector<32x8xf32>
    %71 = arith.truncf %70 : vector<32x8xf32> to vector<32x8xbf16>
    %c0_42 = arith.constant 0 : index
    %c8_43 = arith.constant 8 : index
    %c0_44 = arith.constant 0 : index
    %72 = vector.load %arg8[%c0_42, %c8_43, %c0_44] : memref<1x32x32xbf16, #tpu.memory_space<vmem>>, vector<1x8x32xbf16>
    %73 = vector.shape_cast %72 : vector<1x8x32xbf16> to vector<8x32xbf16>
    %cst_45 = arith.constant dense<0.000000e+00> : vector<32x32xf32>
    %74 = tpu.matmul %71, %73, %cst_45 {dimension_numbers = #tpu.dot_dimension_numbers<[1], [0], [0], [1], [0, 0, 1, 1], [], []>} : vector<32x8xbf16>, vector<8x32xbf16>, vector<32x32xf32> -> vector<32x32xf32>
    %75 = arith.addf %69, %74 : vector<32x32xf32>
    %c0_46 = arith.constant 0 : index
    %c0_47 = arith.constant 0 : index
    %76 = vector.load %arg25[%c0_46, %c0_47] : memref<32x32xf32, #tpu.memory_space<vmem>>, vector<32x32xf32>
    tpu.vector_store %arg25[%c0_46, %c0_47], %75 {strides = array<i32>} : memref<32x32xf32, #tpu.memory_space<vmem>>, vector<32x32xf32>,
    %c0_48 = arith.constant 0 : index
    %c16 = arith.constant 16 : index
    %77 = vector.load %arg24[%c0_48, %c16] : memref<32x96xbf16, #tpu.memory_space<vmem>>, vector<32x8xbf16>
    %78 = vector.shape_cast %77 : vector<32x8xbf16> to vector<2x16x8xbf16>
    %c0_49 = arith.constant 0 : index
    %c48 = arith.constant 48 : index
    %79 = vector.load %arg24[%c0_49, %c48] : memref<32x96xbf16, #tpu.memory_space<vmem>>, vector<32x8xbf16>
    %80 = vector.shape_cast %79 : vector<32x8xbf16> to vector<2x16x8xbf16>
    %c0_50 = arith.constant 0 : index
    %c80 = arith.constant 80 : index
    %81 = vector.load %arg24[%c0_50, %c80] : memref<32x96xbf16, #tpu.memory_space<vmem>>, vector<32x8xbf16>
    %82 = vector.shape_cast %81 : vector<32x8xbf16> to vector<2x16x8xbf16>
    "tpu.trace_start"() <{level = 10 : i32, message = "bqd,bkd->bqk"}> : () -> ()
    %cst_51 = arith.constant dense<0.000000e+00> : vector<2x16x16xf32>
    %83 = tpu.matmul %78, %80, %cst_51 {dimension_numbers = #tpu.dot_dimension_numbers<[2], [2], [1], [1], [0, 0, 0, 1, 1, 1], [0], [0]>} : vector<2x16x8xbf16>, vector<2x16x8xbf16>, vector<2x16x16xf32> -> vector<2x16x16xf32>
    "tpu.trace_stop"() : () -> ()
    %cst_52 = arith.constant 0.353553385 : f32
    %84 = vector.broadcast %cst_52 : f32 to vector<2x16x16xf32>
    %85 = arith.mulf %83, %84 : vector<2x16x16xf32>
    %cst_53 = arith.constant dense<0xFF800000> : vector<2x16xf32>
    %86 = vector.multi_reduction <maximumf>, %85, %cst_53 [2] : vector<2x16x16xf32> to vector<2x16xf32>
    %87 = vector.shape_cast %86 : vector<2x16xf32> to vector<2x16x1xf32>
    %88 = vector.broadcast %87 : vector<2x16x1xf32> to vector<2x16x16xf32>
    %89 = arith.subf %85, %88 : vector<2x16x16xf32>
    %90 = math.exp %89 : vector<2x16x16xf32>
    %cst_54 = arith.constant dense<0.000000e+00> : vector<2x16xf32>
    %91 = vector.multi_reduction <add>, %90, %cst_54 [2] : vector<2x16x16xf32> to vector<2x16xf32>
    %92 = vector.shape_cast %91 : vector<2x16xf32> to vector<2x16x1xf32>
    %93 = tpu.reciprocal %92 {approx = true} : vector<2x16x1xf32> -> vector<2x16x1xf32>
    %94 = vector.broadcast %93 : vector<2x16x1xf32> to vector<2x16x16xf32>
    %95 = arith.mulf %90, %94 : vector<2x16x16xf32>
    %96 = arith.truncf %95 : vector<2x16x16xf32> to vector<2x16x16xbf16>
    "tpu.trace_start"() <{level = 10 : i32, message = "bqk,bkd->bqd"}> : () -> ()
    %cst_55 = arith.constant dense<0.000000e+00> : vector<2x16x8xf32>
    %97 = tpu.matmul %96, %82, %cst_55 {dimension_numbers = #tpu.dot_dimension_numbers<[2], [1], [1], [2], [0, 0, 0, 1, 1, 2], [0], [0]>} : vector<2x16x16xbf16>, vector<2x16x8xbf16>, vector<2x16x8xf32> -> vector<2x16x8xf32>
    "tpu.trace_stop"() : () -> ()
    %c0_56 = arith.constant 0 : index
    %c0_57 = arith.constant 0 : index
    %98 = vector.load %arg25[%c0_56, %c0_57] : memref<32x32xf32, #tpu.memory_space<vmem>>, vector<32x32xf32>
    %99 = vector.shape_cast %97 : vector<2x16x8xf32> to vector<32x8xf32>
    %100 = arith.truncf %99 : vector<32x8xf32> to vector<32x8xbf16>
    %c0_58 = arith.constant 0 : index
    %c16_59 = arith.constant 16 : index
    %c0_60 = arith.constant 0 : index
    %101 = vector.load %arg8[%c0_58, %c16_59, %c0_60] : memref<1x32x32xbf16, #tpu.memory_space<vmem>>, vector<1x8x32xbf16>
    %102 = vector.shape_cast %101 : vector<1x8x32xbf16> to vector<8x32xbf16>
    %cst_61 = arith.constant dense<0.000000e+00> : vector<32x32xf32>
    %103 = tpu.matmul %100, %102, %cst_61 {dimension_numbers = #tpu.dot_dimension_numbers<[1], [0], [0], [1], [0, 0, 1, 1], [], []>} : vector<32x8xbf16>, vector<8x32xbf16>, vector<32x32xf32> -> vector<32x32xf32>
    %104 = arith.addf %98, %103 : vector<32x32xf32>
    %c0_62 = arith.constant 0 : index
    %c0_63 = arith.constant 0 : index
    %105 = vector.load %arg25[%c0_62, %c0_63] : memref<32x32xf32, #tpu.memory_space<vmem>>, vector<32x32xf32>
    tpu.vector_store %arg25[%c0_62, %c0_63], %104 {strides = array<i32>} : memref<32x32xf32, #tpu.memory_space<vmem>>, vector<32x32xf32>,
    %c0_64 = arith.constant 0 : index
    %c24 = arith.constant 24 : index
    %106 = vector.load %arg24[%c0_64, %c24] : memref<32x96xbf16, #tpu.memory_space<vmem>>, vector<32x8xbf16>
    %107 = vector.shape_cast %106 : vector<32x8xbf16> to vector<2x16x8xbf16>
    %c0_65 = arith.constant 0 : index
    %c56 = arith.constant 56 : index
    %108 = vector.load %arg24[%c0_65, %c56] : memref<32x96xbf16, #tpu.memory_space<vmem>>, vector<32x8xbf16>
    %109 = vector.shape_cast %108 : vector<32x8xbf16> to vector<2x16x8xbf16>
    %c0_66 = arith.constant 0 : index
    %c88 = arith.constant 88 : index
    %110 = vector.load %arg24[%c0_66, %c88] : memref<32x96xbf16, #tpu.memory_space<vmem>>, vector<32x8xbf16>
    %111 = vector.shape_cast %110 : vector<32x8xbf16> to vector<2x16x8xbf16>
    "tpu.trace_start"() <{level = 10 : i32, message = "bqd,bkd->bqk"}> : () -> ()
    %cst_67 = arith.constant dense<0.000000e+00> : vector<2x16x16xf32>
    %112 = tpu.matmul %107, %109, %cst_67 {dimension_numbers = #tpu.dot_dimension_numbers<[2], [2], [1], [1], [0, 0, 0, 1, 1, 1], [0], [0]>} : vector<2x16x8xbf16>, vector<2x16x8xbf16>, vector<2x16x16xf32> -> vector<2x16x16xf32>
    "tpu.trace_stop"() : () -> ()
    %cst_68 = arith.constant 0.353553385 : f32
    %113 = vector.broadcast %cst_68 : f32 to vector<2x16x16xf32>
    %114 = arith.mulf %112, %113 : vector<2x16x16xf32>
    %cst_69 = arith.constant dense<0xFF800000> : vector<2x16xf32>
    %115 = vector.multi_reduction <maximumf>, %114, %cst_69 [2] : vector<2x16x16xf32> to vector<2x16xf32>
    %116 = vector.shape_cast %115 : vector<2x16xf32> to vector<2x16x1xf32>
    %117 = vector.broadcast %116 : vector<2x16x1xf32> to vector<2x16x16xf32>
    %118 = arith.subf %114, %117 : vector<2x16x16xf32>
    %119 = math.exp %118 : vector<2x16x16xf32>
    %cst_70 = arith.constant dense<0.000000e+00> : vector<2x16xf32>
    %120 = vector.multi_reduction <add>, %119, %cst_70 [2] : vector<2x16x16xf32> to vector<2x16xf32>
    %121 = vector.shape_cast %120 : vector<2x16xf32> to vector<2x16x1xf32>
    %122 = tpu.reciprocal %121 {approx = true} : vector<2x16x1xf32> -> vector<2x16x1xf32>
    %123 = vector.broadcast %122 : vector<2x16x1xf32> to vector<2x16x16xf32>
    %124 = arith.mulf %119, %123 : vector<2x16x16xf32>
    %125 = arith.truncf %124 : vector<2x16x16xf32> to vector<2x16x16xbf16>
    "tpu.trace_start"() <{level = 10 : i32, message = "bqk,bkd->bqd"}> : () -> ()
    %cst_71 = arith.constant dense<0.000000e+00> : vector<2x16x8xf32>
    %126 = tpu.matmul %125, %111, %cst_71 {dimension_numbers = #tpu.dot_dimension_numbers<[2], [1], [1], [2], [0, 0, 0, 1, 1, 2], [0], [0]>} : vector<2x16x16xbf16>, vector<2x16x8xbf16>, vector<2x16x8xf32> -> vector<2x16x8xf32>
    "tpu.trace_stop"() : () -> ()
    %c0_72 = arith.constant 0 : index
    %c0_73 = arith.constant 0 : index
    %127 = vector.load %arg25[%c0_72, %c0_73] : memref<32x32xf32, #tpu.memory_space<vmem>>, vector<32x32xf32>
    %128 = vector.shape_cast %126 : vector<2x16x8xf32> to vector<32x8xf32>
    %129 = arith.truncf %128 : vector<32x8xf32> to vector<32x8xbf16>
    %c0_74 = arith.constant 0 : index
    %c24_75 = arith.constant 24 : index
    %c0_76 = arith.constant 0 : index
    %130 = vector.load %arg8[%c0_74, %c24_75, %c0_76] : memref<1x32x32xbf16, #tpu.memory_space<vmem>>, vector<1x8x32xbf16>
    %131 = vector.shape_cast %130 : vector<1x8x32xbf16> to vector<8x32xbf16>
    %cst_77 = arith.constant dense<0.000000e+00> : vector<32x32xf32>
    %132 = tpu.matmul %129, %131, %cst_77 {dimension_numbers = #tpu.dot_dimension_numbers<[1], [0], [0], [1], [0, 0, 1, 1], [], []>} : vector<32x8xbf16>, vector<8x32xbf16>, vector<32x32xf32> -> vector<32x32xf32>
    %133 = arith.addf %127, %132 : vector<32x32xf32>
    %c0_78 = arith.constant 0 : index
    %c0_79 = arith.constant 0 : index
    %134 = vector.load %arg25[%c0_78, %c0_79] : memref<32x32xf32, #tpu.memory_space<vmem>>, vector<32x32xf32>
    tpu.vector_store %arg25[%c0_78, %c0_79], %133 {strides = array<i32>} : memref<32x32xf32, #tpu.memory_space<vmem>>, vector<32x32xf32>,
    %c0_80 = arith.constant 0 : index
    %c0_81 = arith.constant 0 : index
    %135 = vector.load %arg25[%c0_80, %c0_81] : memref<32x32xf32, #tpu.memory_space<vmem>>, vector<32x32xf32>
    %136 = arith.addf %3, %135 : vector<32x32xf32>
    %c0_82 = arith.constant 0 : index
    %c0_83 = arith.constant 0 : index
    %c0_84 = arith.constant 0 : index
    %137 = vector.load %arg14[%c0_82, %c0_83, %c0_84] : memref<1x1x32xf32, #tpu.memory_space<vmem>>, vector<1x1x32xf32>
    %138 = vector.shape_cast %137 : vector<1x1x32xf32> to vector<1x32xf32>
    %c0_85 = arith.constant 0 : index
    %c0_86 = arith.constant 0 : index
    %c0_87 = arith.constant 0 : index
    %139 = vector.load %arg15[%c0_85, %c0_86, %c0_87] : memref<1x1x32xf32, #tpu.memory_space<vmem>>, vector<1x1x32xf32>
    %140 = vector.shape_cast %139 : vector<1x1x32xf32> to vector<1x32xf32>
    %cst_88 = arith.constant dense<0.000000e+00> : vector<32xf32>
    %141 = vector.multi_reduction <add>, %136, %cst_88 [1] : vector<32x32xf32> to vector<32xf32>
    %142 = vector.shape_cast %141 : vector<32xf32> to vector<32x1xf32>
    %cst_89 = arith.constant 3.200000e+01 : f32
    %143 = vector.broadcast %cst_89 : f32 to vector<32x1xf32>
    %144 = arith.divf %142, %143 : vector<32x1xf32>
    %145 = arith.mulf %136, %136 : vector<32x32xf32>
    %cst_90 = arith.constant dense<0.000000e+00> : vector<32xf32>
    %146 = vector.multi_reduction <add>, %145, %cst_90 [1] : vector<32x32xf32> to vector<32xf32>
    %147 = vector.shape_cast %146 : vector<32xf32> to vector<32x1xf32>
    %cst_91 = arith.constant 3.200000e+01 : f32
    %148 = vector.broadcast %cst_91 : f32 to vector<32x1xf32>
    %149 = arith.divf %147, %148 : vector<32x1xf32>
    %150 = arith.mulf %144, %144 : vector<32x1xf32>
    %151 = arith.subf %149, %150 : vector<32x1xf32>
    %cst_92 = arith.constant 9.99999974E-6 : f32
    %152 = vector.broadcast %cst_92 : f32 to vector<32x1xf32>
    %153 = arith.addf %151, %152 : vector<32x1xf32>
    %154 = math.rsqrt %153 : vector<32x1xf32>
    %155 = vector.broadcast %138 : vector<1x32xf32> to vector<32x32xf32>
    %156 = vector.broadcast %154 : vector<32x1xf32> to vector<32x32xf32>
    %157 = arith.mulf %155, %156 : vector<32x32xf32>
    %158 = vector.broadcast %144 : vector<32x1xf32> to vector<32x32xf32>
    %159 = arith.subf %136, %158 : vector<32x32xf32>
    %160 = arith.mulf %159, %157 : vector<32x32xf32>
    %161 = vector.broadcast %140 : vector<1x32xf32> to vector<32x32xf32>
    %162 = arith.addf %160, %161 : vector<32x32xf32>
    %163 = arith.truncf %162 : vector<32x32xf32> to vector<32x32xbf16>
    %c0_93 = arith.constant 0 : index
    %c0_94 = arith.constant 0 : index
    %c0_95 = arith.constant 0 : index
    %164 = vector.load %arg10[%c0_93, %c0_94, %c0_95] : memref<1x32x128xbf16, #tpu.memory_space<vmem>>, vector<1x32x128xbf16>
    %165 = vector.shape_cast %164 : vector<1x32x128xbf16> to vector<32x128xbf16>
    %cst_96 = arith.constant dense<0.000000e+00> : vector<32x128xf32>
    %166 = tpu.matmul %163, %165, %cst_96 {dimension_numbers = #tpu.dot_dimension_numbers<[1], [0], [0], [1], [0, 0, 1, 1], [], []>} : vector<32x32xbf16>, vector<32x128xbf16>, vector<32x128xf32> -> vector<32x128xf32>
    %c0_97 = arith.constant 0 : index
    %c0_98 = arith.constant 0 : index
    %c0_99 = arith.constant 0 : index
    %167 = vector.load %arg11[%c0_97, %c0_98, %c0_99] : memref<1x1x128xf32, #tpu.memory_space<vmem>>, vector<1x1x128xf32>
    %168 = vector.shape_cast %167 : vector<1x1x128xf32> to vector<1x128xf32>
    %169 = vector.broadcast %168 : vector<1x128xf32> to vector<32x128xf32>
    %170 = arith.addf %166, %169 : vector<32x128xf32>
    %cst_100 = arith.constant 5.000000e-01 : f32
    %171 = vector.broadcast %cst_100 : f32 to vector<32x128xf32>
    %172 = arith.mulf %171, %170 : vector<32x128xf32>
    %cst_101 = arith.constant 0.707106769 : f32
    %173 = vector.broadcast %cst_101 : f32 to vector<32x128xf32>
    %174 = arith.mulf %170, %173 : vector<32x128xf32>
    %175 = math.erf %174 : vector<32x128xf32>
    %cst_102 = arith.constant 1.000000e+00 : f32
    %176 = vector.broadcast %cst_102 : f32 to vector<32x128xf32>
    %177 = arith.addf %176, %175 : vector<32x128xf32>
    %178 = arith.mulf %172, %177 : vector<32x128xf32>
    %179 = arith.truncf %178 : vector<32x128xf32> to vector<32x128xbf16>
    %c0_103 = arith.constant 0 : index
    %c0_104 = arith.constant 0 : index
    %c0_105 = arith.constant 0 : index
    %180 = vector.load %arg12[%c0_103, %c0_104, %c0_105] : memref<1x128x32xbf16, #tpu.memory_space<vmem>>, vector<1x128x32xbf16>
    %181 = vector.shape_cast %180 : vector<1x128x32xbf16> to vector<128x32xbf16>
    %cst_106 = arith.constant dense<0.000000e+00> : vector<32x32xf32>
    %182 = tpu.matmul %179, %181, %cst_106 {dimension_numbers = #tpu.dot_dimension_numbers<[1], [0], [0], [1], [0, 0, 1, 1], [], []>} : vector<32x128xbf16>, vector<128x32xbf16>, vector<32x32xf32> -> vector<32x32xf32>
    %c0_107 = arith.constant 0 : index
    %c0_108 = arith.constant 0 : index
    %c0_109 = arith.constant 0 : index
    %183 = vector.load %arg13[%c0_107, %c0_108, %c0_109] : memref<1x1x32xf32, #tpu.memory_space<vmem>>, vector<1x1x32xf32>
    %184 = vector.shape_cast %183 : vector<1x1x32xf32> to vector<1x32xf32>
    %185 = vector.broadcast %184 : vector<1x32xf32> to vector<32x32xf32>
    %186 = arith.addf %182, %185 : vector<32x32xf32>
    %187 = arith.addf %162, %186 : vector<32x32xf32>
    %c0_110 = arith.constant 0 : index
    %c0_111 = arith.constant 0 : index
    %c0_112 = arith.constant 0 : index
    %188 = vector.load %arg16[%c0_110, %c0_111, %c0_112] : memref<1x1x32xf32, #tpu.memory_space<vmem>>, vector<1x1x32xf32>
    %189 = vector.shape_cast %188 : vector<1x1x32xf32> to vector<1x32xf32>
    %c0_113 = arith.constant 0 : index
    %c0_114 = arith.constant 0 : index
    %c0_115 = arith.constant 0 : index
    %190 = vector.load %arg17[%c0_113, %c0_114, %c0_115] : memref<1x1x32xf32, #tpu.memory_space<vmem>>, vector<1x1x32xf32>
    %191 = vector.shape_cast %190 : vector<1x1x32xf32> to vector<1x32xf32>
    %cst_116 = arith.constant dense<0.000000e+00> : vector<32xf32>
    %192 = vector.multi_reduction <add>, %187, %cst_116 [1] : vector<32x32xf32> to vector<32xf32>
    %193 = vector.shape_cast %192 : vector<32xf32> to vector<32x1xf32>
    %cst_117 = arith.constant 3.200000e+01 : f32
    %194 = vector.broadcast %cst_117 : f32 to vector<32x1xf32>
    %195 = arith.divf %193, %194 : vector<32x1xf32>
    %196 = arith.mulf %187, %187 : vector<32x32xf32>
    %cst_118 = arith.constant dense<0.000000e+00> : vector<32xf32>
    %197 = vector.multi_reduction <add>, %196, %cst_118 [1] : vector<32x32xf32> to vector<32xf32>
    %198 = vector.shape_cast %197 : vector<32xf32> to vector<32x1xf32>
    %cst_119 = arith.constant 3.200000e+01 : f32
    %199 = vector.broadcast %cst_119 : f32 to vector<32x1xf32>
    %200 = arith.divf %198, %199 : vector<32x1xf32>
    %201 = arith.mulf %195, %195 : vector<32x1xf32>
    %202 = arith.subf %200, %201 : vector<32x1xf32>
    %cst_120 = arith.constant 9.99999974E-6 : f32
    %203 = vector.broadcast %cst_120 : f32 to vector<32x1xf32>
    %204 = arith.addf %202, %203 : vector<32x1xf32>
    %205 = math.rsqrt %204 : vector<32x1xf32>
    %206 = vector.broadcast %189 : vector<1x32xf32> to vector<32x32xf32>
    %207 = vector.broadcast %205 : vector<32x1xf32> to vector<32x32xf32>
    %208 = arith.mulf %206, %207 : vector<32x32xf32>
    %209 = vector.broadcast %195 : vector<32x1xf32> to vector<32x32xf32>
    %210 = arith.subf %187, %209 : vector<32x32xf32>
    %211 = arith.mulf %210, %208 : vector<32x32xf32>
    %212 = vector.broadcast %191 : vector<1x32xf32> to vector<32x32xf32>
    %213 = arith.addf %211, %212 : vector<32x32xf32>
    %c0_121 = arith.constant 0 : index
    %c0_122 = arith.constant 0 : index
    %214 = vector.load %arg23[%c0_121, %c0_122] : memref<32x32xf32, #tpu.memory_space<vmem>>, vector<32x32xf32>
    tpu.vector_store %arg23[%c0_121, %c0_122], %213 {strides = array<i32>} : memref<32x32xf32, #tpu.memory_space<vmem>>, vector<32x32xf32>,
    %c1_i32 = arith.constant 1 : i32
    %215 = arith.cmpi eq, %arg1, %c1_i32 : i32
    %216 = arith.extui %215 : i1 to i32
    %c0_i32_123 = arith.constant 0 : i32
    %217 = arith.cmpi ne, %216, %c0_i32_123 : i32
    scf.if %217 {
      %c0_124 = arith.constant 0 : index
      %c0_125 = arith.constant 0 : index
      %218 = vector.load %arg18[%c0_124, %c0_125] : memref<1x32xf32, #tpu.memory_space<vmem>>, vector<1x32xf32>
      %c0_126 = arith.constant 0 : index
      %c0_127 = arith.constant 0 : index
      %219 = vector.load %arg19[%c0_126, %c0_127] : memref<1x32xf32, #tpu.memory_space<vmem>>, vector<1x32xf32>
      %cst_128 = arith.constant dense<0.000000e+00> : vector<32xf32>
      %220 = vector.multi_reduction <add>, %213, %cst_128 [1] : vector<32x32xf32> to vector<32xf32>
      %221 = vector.shape_cast %220 : vector<32xf32> to vector<32x1xf32>
      %cst_129 = arith.constant 3.200000e+01 : f32
      %222 = vector.broadcast %cst_129 : f32 to vector<32x1xf32>
      %223 = arith.divf %221, %222 : vector<32x1xf32>
      %224 = arith.mulf %213, %213 : vector<32x32xf32>
      %cst_130 = arith.constant dense<0.000000e+00> : vector<32xf32>
      %225 = vector.multi_reduction <add>, %224, %cst_130 [1] : vector<32x32xf32> to vector<32xf32>
      %226 = vector.shape_cast %225 : vector<32xf32> to vector<32x1xf32>
      %cst_131 = arith.constant 3.200000e+01 : f32
      %227 = vector.broadcast %cst_131 : f32 to vector<32x1xf32>
      %228 = arith.divf %226, %227 : vector<32x1xf32>
      %229 = arith.mulf %223, %223 : vector<32x1xf32>
      %230 = arith.subf %228, %229 : vector<32x1xf32>
      %cst_132 = arith.constant 9.99999974E-6 : f32
      %231 = vector.broadcast %cst_132 : f32 to vector<32x1xf32>
      %232 = arith.addf %230, %231 : vector<32x1xf32>
      %233 = math.rsqrt %232 : vector<32x1xf32>
      %234 = vector.broadcast %218 : vector<1x32xf32> to vector<32x32xf32>
      %235 = vector.broadcast %233 : vector<32x1xf32> to vector<32x32xf32>
      %236 = arith.mulf %234, %235 : vector<32x32xf32>
      %237 = vector.broadcast %223 : vector<32x1xf32> to vector<32x32xf32>
      %238 = arith.subf %213, %237 : vector<32x32xf32>
      %239 = arith.mulf %238, %236 : vector<32x32xf32>
      %240 = vector.broadcast %219 : vector<1x32xf32> to vector<32x32xf32>
      %241 = arith.addf %239, %240 : vector<32x32xf32>
      %c0_133 = arith.constant 0 : index
      %c0_134 = arith.constant 0 : index
      %242 = vector.load %arg20[%c0_133, %c0_134] : memref<32x32xbf16, #tpu.memory_space<vmem>>, vector<32x32xbf16>
      %c0_135 = arith.constant 0 : index
      %c0_136 = arith.constant 0 : index
      %243 = vector.load %arg21[%c0_135, %c0_136] : memref<1x32xf32, #tpu.memory_space<vmem>>, vector<1x32xf32>
      %244 = vector.extract_strided_slice %241 {offsets = [8, 0], sizes = [8, 32], strides = [1, 1]} : vector<32x32xf32> to vector<8x32xf32>
      %245 = arith.truncf %244 : vector<8x32xf32> to vector<8x32xbf16>
      %cst_137 = arith.constant dense<0.000000e+00> : vector<8x32xf32>
      %246 = tpu.matmul %245, %242, %cst_137 {dimension_numbers = #tpu.dot_dimension_numbers<[1], [0], [0], [1], [0, 0, 1, 1], [], []>} : vector<8x32xbf16>, vector<32x32xbf16>, vector<8x32xf32> -> vector<8x32xf32>
      %247 = vector.broadcast %243 : vector<1x32xf32> to vector<8x32xf32>
      %248 = arith.addf %246, %247 : vector<8x32xf32>
      %c0_138 = arith.constant 0 : index
      %c0_139 = arith.constant 0 : index
      %c0_140 = arith.constant 0 : index
      %249 = vector.load %arg22[%c0_138, %c0_139, %c0_140] : memref<2x8x32xf32, #tpu.memory_space<vmem>>, vector<1x8x32xf32>
      %250 = vector.shape_cast %249 : vector<1x8x32xf32> to vector<8x32xf32>
      %251 = vector.shape_cast %248 : vector<8x32xf32> to vector<1x8x32xf32>
      tpu.vector_store %arg22[%c0_138, %c0_139, %c0_140], %251 {strides = array<i32>} : memref<2x8x32xf32, #tpu.memory_space<vmem>>, vector<1x8x32xf32>,
      %252 = vector.extract_strided_slice %241 {offsets = [24, 0], sizes = [8, 32], strides = [1, 1]} : vector<32x32xf32> to vector<8x32xf32>
      %253 = arith.truncf %252 : vector<8x32xf32> to vector<8x32xbf16>
      %cst_141 = arith.constant dense<0.000000e+00> : vector<8x32xf32>
      %254 = tpu.matmul %253, %242, %cst_141 {dimension_numbers = #tpu.dot_dimension_numbers<[1], [0], [0], [1], [0, 0, 1, 1], [], []>} : vector<8x32xbf16>, vector<32x32xbf16>, vector<8x32xf32> -> vector<8x32xf32>
      %255 = vector.broadcast %243 : vector<1x32xf32> to vector<8x32xf32>
      %256 = arith.addf %254, %255 : vector<8x32xf32>
      %c1 = arith.constant 1 : index
      %c0_142 = arith.constant 0 : index
      %c0_143 = arith.constant 0 : index
      %257 = vector.load %arg22[%c1, %c0_142, %c0_143] : memref<2x8x32xf32, #tpu.memory_space<vmem>>, vector<1x8x32xf32>
      %258 = vector.shape_cast %257 : vector<1x8x32xf32> to vector<8x32xf32>
      %259 = vector.shape_cast %256 : vector<8x32xf32> to vector<1x8x32xf32>
      tpu.vector_store %arg22[%c1, %c0_142, %c0_143], %259 {strides = array<i32>} : memref<2x8x32xf32, #tpu.memory_space<vmem>>, vector<1x8x32xf32>,
    } else {
    }
    return
  }
  func.func @transform_0(%arg0: i32, %arg1: i32) -> (i32, i32, i32) {
    %c0_i32 = arith.constant 0 : i32
    %c0_i32_0 = arith.constant 0 : i32
    %c0_i32_1 = arith.constant 0 : i32
    return %arg0, %c0_i32, %c0_i32_0 : i32, i32, i32
  }
  func.func @transform_1(%arg0: i32, %arg1: i32) -> (i32, i32) {
    %c0_i32 = arith.constant 0 : i32
    %c0_i32_0 = arith.constant 0 : i32
    %c0_i32_1 = arith.constant 0 : i32
    return %c0_i32, %c0_i32_0 : i32, i32
  }
  func.func @transform_2(%arg0: i32, %arg1: i32) -> (i32, i32) {
    %c0_i32 = arith.constant 0 : i32
    %c0_i32_0 = arith.constant 0 : i32
    %c0_i32_1 = arith.constant 0 : i32
    return %c0_i32, %c0_i32_0 : i32, i32
  }
  func.func @transform_3(%arg0: i32, %arg1: i32) -> (i32, i32) {
    %c0_i32 = arith.constant 0 : i32
    %c0_i32_0 = arith.constant 0 : i32
    %c0_i32_1 = arith.constant 0 : i32
    return %c0_i32, %c0_i32_0 : i32, i32
  }
  func.func @transform_4(%arg0: i32, %arg1: i32) -> (i32, i32, i32) {
    %c0_i32 = arith.constant 0 : i32
    %c0_i32_0 = arith.constant 0 : i32
    %c0_i32_1 = arith.constant 0 : i32
    return %arg1, %c0_i32, %c0_i32_0 : i32, i32, i32
  }
  func.func @transform_5(%arg0: i32, %arg1: i32) -> (i32, i32, i32) {
    %c0_i32 = arith.constant 0 : i32
    %c0_i32_0 = arith.constant 0 : i32
    %c0_i32_1 = arith.constant 0 : i32
    return %arg1, %c0_i32, %c0_i32_0 : i32, i32, i32
  }
  func.func @transform_6(%arg0: i32, %arg1: i32) -> (i32, i32, i32) {
    %c0_i32 = arith.constant 0 : i32
    %c0_i32_0 = arith.constant 0 : i32
    %c0_i32_1 = arith.constant 0 : i32
    return %arg1, %c0_i32, %c0_i32_0 : i32, i32, i32
  }
  func.func @transform_7(%arg0: i32, %arg1: i32) -> (i32, i32, i32) {
    %c0_i32 = arith.constant 0 : i32
    %c0_i32_0 = arith.constant 0 : i32
    %c0_i32_1 = arith.constant 0 : i32
    return %arg1, %c0_i32, %c0_i32_0 : i32, i32, i32
  }
  func.func @transform_8(%arg0: i32, %arg1: i32) -> (i32, i32, i32) {
    %c0_i32 = arith.constant 0 : i32
    %c0_i32_0 = arith.constant 0 : i32
    %c0_i32_1 = arith.constant 0 : i32
    return %arg1, %c0_i32, %c0_i32_0 : i32, i32, i32
  }
  func.func @transform_9(%arg0: i32, %arg1: i32) -> (i32, i32, i32) {
    %c0_i32 = arith.constant 0 : i32
    %c0_i32_0 = arith.constant 0 : i32
    %c0_i32_1 = arith.constant 0 : i32
    return %arg1, %c0_i32, %c0_i32_0 : i32, i32, i32
  }
  func.func @transform_10(%arg0: i32, %arg1: i32) -> (i32, i32, i32) {
    %c0_i32 = arith.constant 0 : i32
    %c0_i32_0 = arith.constant 0 : i32
    %c0_i32_1 = arith.constant 0 : i32
    return %arg1, %c0_i32, %c0_i32_0 : i32, i32, i32
  }
  func.func @transform_11(%arg0: i32, %arg1: i32) -> (i32, i32, i32) {
    %c0_i32 = arith.constant 0 : i32
    %c0_i32_0 = arith.constant 0 : i32
    %c0_i32_1 = arith.constant 0 : i32
    return %arg1, %c0_i32, %c0_i32_0 : i32, i32, i32
  }
  func.func @transform_12(%arg0: i32, %arg1: i32) -> (i32, i32, i32) {
    %c0_i32 = arith.constant 0 : i32
    %c0_i32_0 = arith.constant 0 : i32
    %c0_i32_1 = arith.constant 0 : i32
    return %arg1, %c0_i32, %c0_i32_0 : i32, i32, i32
  }
  func.func @transform_13(%arg0: i32, %arg1: i32) -> (i32, i32, i32) {
    %c0_i32 = arith.constant 0 : i32
    %c0_i32_0 = arith.constant 0 : i32
    %c0_i32_1 = arith.constant 0 : i32
    return %arg1, %c0_i32, %c0_i32_0 : i32, i32, i32
  }
  func.func @transform_14(%arg0: i32, %arg1: i32) -> (i32, i32, i32) {
    %c0_i32 = arith.constant 0 : i32
    %c0_i32_0 = arith.constant 0 : i32
    %c0_i32_1 = arith.constant 0 : i32
    return %arg1, %c0_i32, %c0_i32_0 : i32, i32, i32
  }
  func.func @transform_15(%arg0: i32, %arg1: i32) -> (i32, i32, i32) {
    %c0_i32 = arith.constant 0 : i32
    %c0_i32_0 = arith.constant 0 : i32
    %c0_i32_1 = arith.constant 0 : i32
    return %arg1, %c0_i32, %c0_i32_0 : i32, i32, i32
  }
  func.func @transform_16(%arg0: i32, %arg1: i32) -> (i32, i32) {
    %c0_i32 = arith.constant 0 : i32
    %c0_i32_0 = arith.constant 0 : i32
    %c0_i32_1 = arith.constant 0 : i32
    return %c0_i32, %c0_i32_0 : i32, i32
  }
  func.func @transform_17(%arg0: i32, %arg1: i32) -> (i32, i32) {
    %c0_i32 = arith.constant 0 : i32
    %c0_i32_0 = arith.constant 0 : i32
    %c0_i32_1 = arith.constant 0 : i32
    return %c0_i32, %c0_i32_0 : i32, i32
  }
  func.func @transform_18(%arg0: i32, %arg1: i32) -> (i32, i32) {
    %c0_i32 = arith.constant 0 : i32
    %c0_i32_0 = arith.constant 0 : i32
    %c0_i32_1 = arith.constant 0 : i32
    return %c0_i32, %c0_i32_0 : i32, i32
  }
  func.func @transform_19(%arg0: i32, %arg1: i32) -> (i32, i32) {
    %c0_i32 = arith.constant 0 : i32
    %c0_i32_0 = arith.constant 0 : i32
    %c0_i32_1 = arith.constant 0 : i32
    return %c0_i32, %c0_i32_0 : i32, i32
  }
  func.func @transform_20(%arg0: i32, %arg1: i32) -> (i32, i32, i32) {
    %c0_i32 = arith.constant 0 : i32
    %c0_i32_0 = arith.constant 0 : i32
    %c0_i32_1 = arith.constant 0 : i32
    return %arg0, %c0_i32, %c0_i32_0 : i32, i32, i32
  }
}

</mosaic_0001>

<bundles_post_ra>
// kernel: tpu_custom_call.1
= control target key start
LH: loop header
LB: loop body
LE: loop exit
PB: predicated region body
PF: predicated region fallthrough
CT: control target
= control target key end

     0   :  { %s3821_s0 = inlined_call_operand.vmem [shape: f32[2,8,32], index: 0, kind: input, shape index: {}]   ;;  %s3822_s1 = inlined_call_operand.vmem [shape: bf16[32,32], index: 1, kind: input, shape index: {}]   ;;  %s3823_s2 = inlined_call_operand.vmem [shape: f32[1,32], index: 2, kind: input, shape index: {}]   ;;  %s3824_s3 = inlined_call_operand.hbm [shape: f32[1,32], index: 3, kind: input, shape index: {}]   ;;  %s3825_s4 = inlined_call_operand.vmem [shape: bf16[2,32,96], index: 4, kind: input, shape index: {}]   ;;  %s3826_s5 = inlined_call_operand.vmem [shape: f32[2,1,96], index: 5, kind: input, shape index: {}]   ;;  %s3827_s6 = inlined_call_operand.vmem [shape: bf16[2,32,32], index: 6, kind: input, shape index: {}]   ;;  %s3828_s7 = inlined_call_operand.vmem [shape: f32[2,1,32], index: 7, kind: input, shape index: {}]   ;;  %s3829_s8 = inlined_call_operand.vmem [shape: bf16[2,32,128], index: 8, kind: input, shape index: {}]   ;;  %s3830_s9 = inlined_call_operand.vmem [shape: f32[2,1,128], index: 9, kind: input, shape index: {}]   ;;  %s3831_s10 = inlined_call_operand.vmem [shape: bf16[2,128,32], index: 10, kind: input, shape index: {}]   ;;  %s3832_s11 = inlined_call_operand.vmem [shape: f32[2,1,32], index: 11, kind: input, shape index: {}]   ;;  %s3833_s12 = inlined_call_operand.vmem [shape: f32[2,1,32], index: 12, kind: input, shape index: {}]   ;;  %s3834_s13 = inlined_call_operand.vmem [shape: f32[2,1,32], index: 13, kind: input, shape index: {}]   ;;  %s3835_s14 = inlined_call_operand.vmem [shape: f32[2,1,32], index: 14, kind: input, shape index: {}]   ;;  %s3836_s15 = inlined_call_operand.vmem [shape: f32[2,1,32], index: 15, kind: input, shape index: {}]   ;;  %s3837_s16 = inlined_call_operand.vmem [shape: f32[1,32], index: 16, kind: input, shape index: {}]   ;;  %s3838_s17 = inlined_call_operand.vmem [shape: f32[1,32], index: 17, kind: input, shape index: {}]   ;;  %s3839_s18 = inlined_call_operand.vmem [shape: bf16[32,32], index: 18, kind: input, shape index: {}]   ;;  %s3840_s19 = inlined_call_operand.vmem [shape: f32[1,32], index: 19, kind: input, shape index: {}]   ;;  %s3841_s20 = inlined_call_operand.hbm [shape: f32[2,8,32], index: 20, kind: output, shape index: {}]  }
   0x1   :  { %3848 = sst [smem:[#allocation14_spill]] %s3821_s0 }
   0x2   :  { %3849 = sst [smem:[#allocation15_spill]] %s3822_s1 }
   0x3   :  { %3850 = sst [smem:[#allocation16_spill]] %s3823_s2 }
   0x4   :  { %3851 = sst [smem:[#allocation17_spill]] %s3824_s3 }
   0x5   :  { %3852 = sst [smem:[#allocation18_spill]] %s3825_s4 }
   0x6   :  { %3853 = sst [smem:[#allocation19_spill]] %s3827_s6 }
   0x7   :  { %3854 = sst [smem:[#allocation20_spill]] %s3829_s8 }
   0x8   :  { %3855 = sst [smem:[#allocation21_spill]] %s3837_s16 }
   0x9   :  { %3856 = sst [smem:[#allocation22_spill]] %s3838_s17 }
   0xa   :  { %3857 = sst [smem:[#allocation23_spill]] %s3839_s18 }
   0xb   :  { %3858 = sst [smem:[#allocation24_spill]] %s3840_s19 }
   0xc   :  { %3859 = sst [smem:[#allocation25_spill]] %s3841_s20 }
   0xd   :  { %25 = vsyncpa [#allocation6], 0 }
   0xe   :  { %26 = vsyncpa [#allocation7], 0  ;;  %s3251_s1 = smov 0   ;;  %s3253_s22 = smov 0  }
   0xf   :  { %s3255_s23 = smov 0  }
  0x10 LB: > { %3860 = sst [smem:[#allocation11_spill]] %s3124_s22  ;;  %s3844_s24 = sadd.s32 4294967295, %s3128_s23   ;;  %s3128_s23 = sphi %s3255_s23, %s32_s23   ;;  %s3124_s22 = sphi %s3253_s22, %s3882_s22   ;;  %s3120_s1 = sphi %s3251_s1, %s3881_s1  }
  0x11   : > { %3861 = sst [smem:[#allocation12_spill]] %s3128_s23  ;;  %s41_s2 = sadd.s32 1, %s3124_s22 }
  0x12   : > { %p42_p0 = scmp.ge.s32.totalorder %s41_s2, 2  ;;  %p2690_p1 = scmp.ge.s32.totalorder %s3128_s23, 1 }
  0x13   : > { %p560_p2 = scmp.lt.s32.totalorder %s3128_s23, 3  ;;  %p2885_p4 = scmp.eq.s32.totalorder %s3844_s24, 0 }
  0x14   : > { %s3884_s2 = smov (%p42_p0, %s41_s2), 0  ;;  %s3863_s26 = sld [smem:[#allocation17_spill]] }
  0x15   : > { %3862 = sst [smem:[#allocation13_spill]] %s3884_s2  ;;  %p561_p3 = pnand %p2690_p1, %p560_p2 }
  0x16   : > { %s3130_s28 = smov [#allocation5]  }
  0x17   : > { %p2881_p5 = pneg %p561_p3  ;;  %s589_s4 = sshll.u32 %s3130_s28, 4  ;;  %s590_s4 = int_to_ptr.vmem [resolvable:$true] %s589_s4 }
  0x18   : > { %694 = sbr.rel (%p561_p3) target bundleno = 3167 (0xc5f), region = 100 }
  0x19   : > { %p2882_p6 = pnand %p2885_p4, %p2881_p5 }
  0x1a   : > { %s587_s27 = sshll.u32 %s3863_s26, 4  ;;  %s588_s27 = int_to_ptr.hbm [resolvable:$true] %s587_s27 }
  0x1b   : > { %2884 = dma.hbm_to_vmem [thread:$0]  (!%p2882_p6), %s588_s27, 16, %s590_s4, [#allocation6]  }
  0x1d   : > { %3111 = dma.done.wait (%p2885_p4), [#allocation6], 16  }
  0x1e   : > { %3113 = vsyncadd (%p2885_p4), [#allocation6], 4294967280  ;;  %p798_p7 = scmp.lt.s32.totalorder %s3120_s1, 1  ;;  %s3864_s27 = sld [smem:[#allocation18_spill]] }
  0x1f   : > { %s3865_s6 = sld [smem:[#allocation19_spill]]  ;;  %p2704_p8 = scmp.ne.s32.totalorder %s3120_s1, 0 }
  0x20   : > { %s3279_s29 = scalar_select %p798_p7, %s3120_s1, 1 }
  0x21   : > { %s3866_s8 = sld [smem:[#allocation20_spill]] }
  0x22   : > { %s2843_s30 = sshll.u32 %s3279_s29, 4  ;;  %s2846_s26 = sshll.u32 %s3279_s29, 6 }
  0x23   : > { %s3313_s24 = scalar_lea.vmem %s3831_s10, %s2846_s26  ;;  %s829_s20 = scalar_lea.vmem %s3832_s11, %s3279_s29 }
  0x24   : > { %s3289_s28 = scalar_lea.vmem %s3864_s27, %s2843_s30  ;;  %s832_s17 = scalar_lea.vmem %s3833_s12, %s3279_s29 }
  0x25   : > { %s3294_s2 = scalar_lea.vmem %s3865_s6, %s2843_s30  ;;  %s838_s3 = scalar_lea.vmem %s3835_s14, %s3279_s29 }
  0x26   : > { %s841_s26 = scalar_lea.vmem %s3836_s15, %s3279_s29  ;;  %847 = sbr.rel (%p2704_p8) target bundleno = 188 (0xbc), region = 108 }
  0x27   : > { %s3303_s16 = scalar_lea.vmem %s3866_s8, %s2843_s30  ;;  %s835_s8 = scalar_lea.vmem %s3834_s13, %s3279_s29 }
  0x28   : > { %s3867_s4 = sld [smem:[#allocation15_spill]] (!%p2704_p8) }
  0x29   : > { %s3868_s0 = sld [smem:[#allocation14_spill]] (!%p2704_p8) }
  0x2a   : > { %s3869_s27 = sld [smem:[#allocation16_spill]] (!%p2704_p8) }
  0x2b   : > { %v2929_v2 = vld [vmem:[#allocation5] ss:$0 sm:$0xff]  ;;  %vm874_vm0 = vcmask 261120  }
  0x2c   : > { %892 = vst.msk [vmem:[#allocation2 + $0x8] sm:$0xff] %vm874_vm0, %v2929_v2 }
  0x2d   : > { %913 = vst.msk [vmem:[#allocation2 + $0x18] sm:$0xff] %vm874_vm0, %v2929_v2 }
  0x2e   : > { %v2848_v0 = vld [vmem:[%s3867_s4 + $0x8] sm:$0xff]  ;;  %v2847_v1 = vld [vmem:[%s3867_s4] sm:$0xff] }
  0x2f   : > { %884 = vmatpush.bf16.msra.mxu0 %v2848_v0  ;;  %905 = vmatpush.bf16.msra.mxu1 %v2848_v0  ;;  %v857_v3 = vld [vmem:[%s3868_s0] sm:$0xff]  ;;  %v2714_v4 = vld [vmem:[%s3868_s0 + $0x8] sm:$0xff] }
  0x30   : > { %v858_v5 = vpack.c.bf16 %v857_v3, %v857_v3  ;;  %v895_v6 = vpack.c.bf16 %v2714_v4, %v2714_v4  ;;  %v2930_v7 = vld [vmem:[%s3869_s27] ss:$0 sm:$0xff] }
  0x33   : > { %885 = vmatpush.bf16.msra.mxu0 %v2847_v1  ;;  %906 = vmatpush.bf16.msra.mxu1 %v2847_v1 }
  0x36   : > { %2713 = vmatmul.msk.bf16.vlgmr.msra.gmra.mxu0 %vm874_vm0, %v858_v5  ;;  %2715 = vmatmul.msk.bf16.vlgmr.msra.gmra.mxu1 %vm874_vm0, %v895_v6 }
  0xb3   : > { %v887_v8 = vpop.f32.mrf.mxu0  ;;  %v908_v9 = vpop.f32.mrf.mxu1 }
  0xb4   : > { %v888_v10 = vadd.f32 %v2930_v7, %v887_v8  ;;  %v909_v11 = vadd.f32 %v2930_v7, %v908_v9 }
  0xb6   : > { %891 = vst.msk [vmem:[#allocation2] sm:$0xff] %vm874_vm0, %v888_v10 }
  0xb7   : > { %912 = vst.msk [vmem:[#allocation2 + $0x10] sm:$0xff] %vm874_vm0, %v909_v11 }
  0xbb   : > { %v889_v12 = vpop.f32.mrf.mxu0  ;;  %v910_v13 = vpop.f32.mrf.mxu1 }
  0xbc PF: > { %v2850_v14 = vld [vmem:[%s3289_s28 + $0x8] sm:$0xff]  ;;  %v2849_v15 = vld [vmem:[%s3289_s28] sm:$0xff]  ;;  %v917_v19 = vld [vmem:[#allocation2 + $0x18] sm:$0xff]  ;;  %vm940_vm1 = vcmask 261120   ;;  %s3870_s19 = scalar_lea.vmem %s3826_s5, %s3279_s29  ;;  %vm970_vm2 = vcmask 781312   ;;  %s3131_s28 = smov 88  }
  0xbd   : > { %v914_v16 = vld [vmem:[#allocation2] sm:$0xff]  ;;  %v915_v17 = vld [vmem:[#allocation2 + $0x8] sm:$0xff]  ;;  %953 = vmatpush.bf16.msra.mxu0 %v2850_v14  ;;  %2871 = vmatpush.bf16.msra.mxu2 %v2850_v14  ;;  %s3132_s30 = smov 96   ;;  %s3133_s18 = smov 120   ;;  %vm994_vm3 = vcmask 64512   ;;  %vm1046_vm4 = vcmask 130048  }
  0xbe   : > { %v916_v18 = vld [vmem:[#allocation2 + $0x10] sm:$0xff]  ;;  %v918_v20 = vpack.c.bf16 %v915_v17, %v914_v16  ;;  %v2931_v22 = vld [vmem:[%s3870_s19] ss:$0 sm:$0xff]  ;;  %s3134_s21 = smov 64   ;;  %s3135_s25 = smov 112   ;;  %vm1158_vm5 = vcmask 1043456  }
  0xbf   : > { %v919_v21 = vpack.c.bf16 %v917_v19, %v916_v18  ;;  %s3136_s6 = smov 80   ;;  %s3137_s27 = smov 56  }
  0xc0   : > { %s3871_s19 = scalar_lea.vmem %s3828_s7, %s3279_s29  ;;  %p2828_p9 = scmp.ne.s32.totalorder %s3120_s1, 1 }
  0xc1   : > { %954 = vmatpush.bf16.msra.mxu0 %v2849_v15  ;;  %2872 = vmatpush.bf16.msra.mxu2 %v2849_v15 }
  0xc4   : > { %2724 = vmatmul.msk.bf16.vlgmr.msra.gmra.mxu0 %vm940_vm1, %v918_v20  ;;  %2725 = vmatmul.msk.bf16.vlgmr.msra.gmra.mxu2 %vm940_vm1, %v919_v21 }
 0x141   : > { %v956_v23 = vpop.f32.mrf.mxu0 }
 0x142   : > { %v957_v24 = vadd.f32 %v2931_v22, %v956_v23 }
 0x144   : > { %v966_v25 = vpack.c.bf16 %v957_v24, %v957_v24 }
 0x146   : > { %971 = vst.msk [vmem:[#allocation3] sm:$0xf] %vm970_vm2, %v966_v25 }
 0x147   : > { %v961_v26 = vpop.f32.mrf.mxu2 }
 0x148   : > { %v962_v27 = vadd.f32 %v2931_v22, %v961_v26 }
 0x149   : > { %v958_v28 = vpop.f32.mrf.mxu0 }
 0x14a   : > { %v968_v29 = vpack.c.bf16 %v962_v27, %v962_v27  ;;  %v959_v30 = vadd.f32 %v2931_v22, %v958_v28 }
 0x14c   : > { %973 = vst.msk [vmem:[#allocation3 + $0x8] sm:$0xf] %vm970_vm2, %v968_v29  ;;  %v967_v31 = vpack.c.bf16 %v959_v30, %v959_v30 }
 0x14e   : > { %972 = vst.msk [vmem:[#allocation3 + $0x4] sm:$0xf] %vm970_vm2, %v967_v31 }
 0x14f   : > { %v963_v32 = vpop.f32.mrf.mxu2 }
 0x150   : > { %v964_v33 = vadd.f32 %v2931_v22, %v963_v32 }
 0x152   : > { %v969_v34 = vpack.c.bf16 %v964_v33, %v964_v33 }
 0x154   : > { %974 = vst.msk [vmem:[#allocation3 + $0xc] sm:$0xf] %vm970_vm2, %v969_v34 }
 0x155   : > { %v3366_v35 = vld [vmem:[#allocation3] sm:$0xff] }
 0x156   : > { %v3368_v36 = vld [vmem:[#allocation3] sm:$0xff]  ;;  %1200 = vrot.lane.b32.xlu1 %v3366_v35, %s3131_s28 }
 0x157   : > { %992 = vrot.lane.b32.xlu0 %v3368_v36, %s3132_s30  ;;  %v3395_v1 = vld [vmem:[#allocation3] sm:$0xff] }
 0x15b   : > { %v2852_v37 = vld [vmem:[#allocation3 + $0x8] sm:$0xff] }
 0x15c   : > { %v3387_v57 = vld [vmem:[#allocation3 + $0x8] sm:$0xff] }
 0x15e   : > { %1198 = vrot.lane.b32.xlu1 %v3366_v35, %s3133_s18 }
 0x15f   : > { %1020 = vrot.lane.b32.xlu0 %v2852_v37, %s3132_s30  ;;  %s3139_s30 = smov 104  }
 0x1c8   : > { %v1201_v40 = vpop.permute.xlu1 %1200 }
 0x1c9   : > { %v993_v38 = vpop.permute.xlu0 %992  ;;  %v1206_v43 = vsel %vm994_vm3, %v1201_v40, 0 }
 0x1ca   : > { %v999_v39 = vsel %vm994_vm3, %v993_v38, 0 }
 0x1cb   : > { %1008 = vmatpush.bf16.xpose.msra.mxu1 %v999_v39 }
 0x1d0   : > { %v1199_v44 = vpop.permute.xlu1 %1198 }
 0x1d1   : > { %v1021_v41 = vpop.permute.xlu0 %1020 }
 0x1d2   : > { %2730 = vmatmul.msk.bf16.vlgmr.msra.gmra.mxu1 %vm994_vm3, %v3368_v36  ;;  %v1026_v42 = vsel %vm994_vm3, %v1021_v41, 0 }
 0x1d3   : > { %1035 = vmatpush.bf16.xpose.msrb.mxu2 %v1026_v42 }
 0x1da   : > { %2735 = vmatmul.msk.bf16.vlgmr.msrb.gmra.mxu2 %vm994_vm3, %v2852_v37 }
 0x1db   : > { %1215 = vmatpush.bf16.xpose.msra.mxu2 %v1206_v43 }
 0x1ea   : > { %2744 = vmatmul.msk.bf16.vlgmr.msra.gmra.mxu2 %vm994_vm3, %v1199_v44 }
 0x24f   : > { %v1010_v45 = vpop.f32.mrf.mxu1 }
 0x250   : > { %v1042_v46 = vmul.f32 0.35355338, %v1010_v45 }
 0x252   : > { %v1047_v47 = vsel %vm1046_vm4, %v1042_v46, -inf }
 0x253   : > { %1048 = vmax.xlane.f32.xlu2 %v1047_v47 }
 0x257   : > { %v1012_v48 = vpop.f32.mrf.mxu1 }
 0x258   : > { %v1043_v49 = vmul.f32 0.35355338, %v1012_v48 }
 0x25a   : > { %v1050_v50 = vsel %vm1046_vm4, %v1043_v49, -inf }
 0x25b   : > { %1051 = vmax.xlane.f32.xlu2 %v1050_v50 }
 0x25d   : > { %v1037_v51 = vpop.f32.mrf.mxu2 }
 0x25e   : > { %v1044_v52 = vmul.f32 0.35355338, %v1037_v51 }
 0x260   : > { %v1053_v53 = vsel %vm1046_vm4, %v1044_v52, -inf }
 0x261   : > { %1054 = vmax.xlane.f32.xlu0 %v1053_v53 }
 0x265   : > { %v1039_v54 = vpop.f32.mrf.mxu2 }
 0x266   : > { %v1045_v55 = vmul.f32 0.35355338, %v1039_v54 }
 0x268   : > { %v1056_v56 = vsel %vm1046_vm4, %v1045_v55, -inf }
 0x269   : > { %1057 = vmax.xlane.f32.xlu1 %v1056_v56 }
 0x26d   : > { %v1217_v58 = vpop.f32.mrf.mxu2 }
 0x26e   : > { %v1251_v19 = vmul.f32 0.35355338, %v1217_v58 }
 0x270   : > { %v1255_v20 = vsel %vm1046_vm4, %v1251_v19, -inf }
 0x275   : > { %v1219_v59 = vpop.f32.mrf.mxu2 }
 0x276   : > { %v3391_v60 = vmul.f32 0.35355338, %v1219_v59 }
 0x278   : > { %v1258_v61 = vsel %vm1046_vm4, %v3391_v60, -inf }
 0x282   : > { %1125 = vrot.lane.b32.xlu1 %v2852_v37, %s3134_s21 }
 0x28a   : > { %1227 = vrot.lane.b32.xlu1 %v3387_v57, %s3133_s18  ;;  %s3140_s18 = smov 48  }
 0x2b4   : > { %1259 = vmax.xlane.f32.xlu1 %v1258_v61 }
 0x2c6   : > { %v1049_v62 = vpop.xlane.xlu2 %1048 }
 0x2c7   : > { %v1059_v63 = vsub.f32 %v1042_v46, %v1049_v62 }
 0x2c9   : > { %v1063_v0 = vmul.f32 1.442695, %v1059_v63 }
 0x2cb   : > { %2939 = vpow2.f32 %v1063_v0 }
 0x2cd   : > { %1405 = vrot.lane.b32.xlu1 %v3395_v1, %s3135_s25 }
 0x2ce   : > { %v1052_v2 = vpop.xlane.xlu2 %1051 }
 0x2cf   : > { %v1060_v3 = vsub.f32 %v1043_v49, %v1052_v2 }
 0x2d1   : > { %v2940_v4 = vpop.eup %2939  ;;  %v1065_v5 = vmul.f32 1.442695, %v1060_v3 }
 0x2d2   : > { %v1071_v6 = vsel %vm1046_vm4, %v2940_v4, 0.0 }
 0x2d3   : > { %2941 = vpow2.f32 %v1065_v5  ;;  %1072 = vadd.xlane.f32.xlu2 %v1071_v6  ;;  %v2932_v5 = vld [vmem:[%s3871_s19] ss:$0 sm:$0xff] }
 0x2d4   : > { %v1055_v14 = vpop.xlane.xlu0 %1054  ;;  %979 = vst.msk [vmem:[#allocation4] sm:$0xff] %vm940_vm1, %v2932_v5 }
 0x2d5   : > { %v1061_v15 = vsub.f32 %v1044_v52, %v1055_v14  ;;  %980 = vst.msk [vmem:[#allocation4 + $0x8] sm:$0xff] %vm940_vm1, %v2932_v5 }
 0x2d6   : > { %981 = vst.msk [vmem:[#allocation4 + $0x10] sm:$0xff] %vm940_vm1, %v2932_v5 }
 0x2d7   : > { %v1067_v16 = vmul.f32 1.442695, %v1061_v15  ;;  %982 = vst.msk [vmem:[#allocation4 + $0x18] sm:$0xff] %vm940_vm1, %v2932_v5 }
 0x2d9   : > { %v2942_v7 = vpop.eup %2941 }
 0x2da   : > { %v1074_v8 = vsel %vm1046_vm4, %v2942_v7, 0.0 }
 0x2db   : > { %1075 = vadd.xlane.f32.xlu2 %v1074_v8 }
 0x2dc   : > { %v1058_v9 = vpop.xlane.xlu1 %1057 }
 0x2dd   : > { %v1062_v10 = vsub.f32 %v1045_v55, %v1058_v9 }
 0x2df   : > { %v1069_v11 = vmul.f32 1.442695, %v1062_v10 }
 0x2e1   : > { %2943 = vpow2.f32 %v1069_v11 }
 0x2e2   : > { %2945 = vpow2.f32 %v1067_v16 }
 0x2e7   : > { %v2944_v12 = vpop.eup %2943 }
 0x2e8   : > { %v1080_v13 = vsel %vm1046_vm4, %v2944_v12, 0.0  ;;  %v2946_v17 = vpop.eup %2945 }
 0x2e9   : > { %1081 = vadd.xlane.f32.xlu0 %v1080_v13  ;;  %v1077_v18 = vsel %vm1046_vm4, %v2946_v17, 0.0 }
 0x2f3   : > { %1100 = vrot.lane.b32.xlu2 %v3368_v36, %s3134_s21  ;;  %s3141_s21 = smov 40  }
 0x2f4   : > { %v1126_v29 = vpop.permute.xlu1 %1125 }
 0x2fc   : > { %v1228_v40 = vpop.permute.xlu1 %1227 }
 0x2fd   : > { %1229 = vrot.lane.b32.xlu0 %v3387_v57, %s3131_s28  ;;  %s3138_s28 = smov 72  }
 0x31c   : > { %1078 = vadd.xlane.f32.xlu2 %v1077_v18 }
 0x327   : > { %1256 = vmax.xlane.f32.xlu0 %v1255_v20  ;;  %v1260_v46 = vpop.xlane.xlu1 %1259 }
 0x328   : > { %v1268_v51 = vsub.f32 %v3391_v60, %v1260_v46  ;;  %v1151_v60 = vld [vmem:[%s3294_s2] sm:$0xf] }
 0x329   : > { %v1160_v61 = vsel %vm1158_vm5, %v1151_v60, 0 }
 0x32a   : > { %v1273_v54 = vmul.f32 1.442695, %v1268_v51  ;;  %1169 = vmatpush.bf16.msrb.mxu1 %v1160_v61  ;;  %v3450_v61 = vld [vmem:[#allocation3 + $0x8] sm:$0xff] }
 0x33b   : > { %1407 = vrot.lane.b32.xlu0 %v3395_v1, %s3136_s6 }
 0x346   : > { %v1073_v21 = vpop.xlane.xlu2 %1072 }
 0x347   : > { %2947 = vrcp.f32 %v1073_v21 }
 0x34d   : > { %v2948_v23 = vpop.eup %2947 }
 0x34e   : > { %v1076_v22 = vpop.xlane.xlu2 %1075  ;;  %v1087_v24 = vmul.f32 %v2948_v23, %v2940_v4 }
 0x34f   : > { %2949 = vrcp.f32 %v1076_v22 }
 0x350   : > { %v1091_v28 = vpack.c.bf16 %v1087_v24, %v1087_v24 }
 0x352   : > { %v1097_v31 = vunpack.c.l.b16 %v1091_v28 }
 0x355   : > { %v2950_v25 = vpop.eup %2949 }
 0x356   : > { %v1101_v26 = vpop.permute.xlu2 %1100  ;;  %v1088_v27 = vmul.f32 %v2950_v25, %v2942_v7  ;;  %v1406_v25 = vpop.permute.xlu1 %1405 }
 0x357   : > { %1113 = vmatpush.bf16.msra.mxu3 %v1101_v26  ;;  %v1145_v26 = vld [vmem:[#allocation4] sm:$0xff] }
 0x358   : > { %v1092_v30 = vpack.c.bf16 %v1088_v27, %v1088_v27 }
 0x35a   : > { %v1098_v32 = vunpack.c.l.b16 %v1092_v30 }
 0x35b   : > { %1138 = vmatpush.bf16.msrb.mxu3 %v1126_v29  ;;  %v1146_v29 = vld [vmem:[#allocation4 + $0x8] sm:$0xff] }
 0x35c   : > { %v1099_v33 = vpack.c.b16 %v1098_v32, %v1097_v31  ;;  %v1082_v34 = vpop.xlane.xlu0 %1081  ;;  %v1359_v32 = vld [vmem:[%s3294_s2 + $0x4] sm:$0xf] }
 0x35d   : > { %2951 = vrcp.f32 %v1082_v34  ;;  %v1147_v34 = vld [vmem:[#allocation4 + $0x10] sm:$0xff] }
 0x35e   : > { %2736 = vmatmul.msk.bf16.vlgmr.msra.gmra.mxu3 %vm1046_vm4, %v1099_v33  ;;  %v1367_v33 = vsel %vm1158_vm5, %v1359_v32, 0 }
 0x363   : > { %v2952_v39 = vpop.eup %2951 }
 0x364   : > { %v1090_v41 = vmul.f32 %v2952_v39, %v2944_v12 }
 0x366   : > { %v1094_v43 = vpack.c.bf16 %v1090_v41, %v1090_v41 }
 0x368   : > { %v1123_v48 = vunpack.c.l.b16 %v1094_v43 }
 0x36f   : > { %v1230_v36 = vpop.permute.xlu0 %1229 }
 0x370   : > { %v1235_v37 = vsel %vm994_vm3, %v1230_v36, 0 }
 0x371   : > { %1244 = vmatpush.bf16.xpose.msra.mxu3 %v1235_v37 }
 0x38f   : > { %v1079_v38 = vpop.xlane.xlu2 %1078 }
 0x390   : > { %2953 = vrcp.f32 %v1079_v38 }
 0x396   : > { %v2954_v42 = vpop.eup %2953 }
 0x397   : > { %v1089_v44 = vmul.f32 %v2954_v42, %v2946_v17  ;;  %v1148_v42 = vld [vmem:[#allocation4 + $0x18] sm:$0xff] }
 0x399   : > { %v1093_v45 = vpack.c.bf16 %v1089_v44, %v1089_v44 }
 0x39a   : > { %v1257_v47 = vpop.xlane.xlu0 %1256 }
 0x39b   : > { %v1122_v49 = vunpack.c.l.b16 %v1093_v45  ;;  %v1267_v50 = vsub.f32 %v1251_v19, %v1257_v47 }
 0x39d   : > { %v1271_v52 = vmul.f32 1.442695, %v1267_v50  ;;  %v1124_v53 = vpack.c.b16 %v1123_v48, %v1122_v49 }
 0x39f   : > { %2955 = vpow2.f32 %v1271_v52  ;;  %2737 = vmatmul.msk.bf16.vlgmr.msrb.gmra.mxu3 %vm1046_vm4, %v1124_v53 }
 0x3a0   : > { %2957 = vpow2.f32 %v1273_v54  ;;  %1376 = vmatpush.bf16.msrb.mxu3 %v1367_v33 }
 0x3a5   : > { %v2956_v55 = vpop.eup %2955 }
 0x3a6   : > { %v1279_v56 = vsel %vm1046_vm4, %v2956_v55, 0.0  ;;  %v2958_v58 = vpop.eup %2957 }
 0x3a7   : > { %1280 = vadd.xlane.f32.xlu2 %v1279_v56  ;;  %v1282_v59 = vsel %vm1046_vm4, %v2958_v58, 0.0 }
 0x3ad   : > { %v1408_v7 = vpop.permute.xlu0 %1407 }
 0x3ae   : > { %v1413_v13 = vsel %vm994_vm3, %v1408_v7, 0 }
 0x3af   : > { %2749 = vmatmul.msk.bf16.vlgmr.msra.gmra.mxu3 %vm994_vm3, %v1228_v40  ;;  %1283 = vadd.xlane.f32.xlu2 %v1282_v59 }
 0x3c7   : > { %1308 = vrot.lane.b32.xlu2 %v3366_v35, %s3137_s27 }
 0x3e1   : > { %v1115_v62 = vpop.f32.mrf.mxu3 }
 0x3e9   : > { %v1117_v63 = vpop.f32.mrf.mxu3 }
 0x3ea   : > { %v1149_v0 = vpack.c.bf16 %v1117_v63, %v1115_v62  ;;  %v3456_v62 = vld [vmem:[#allocation3] sm:$0xff] }
 0x3ec   : > { %2738 = vmatmul.msk.bf16.vlgmr.msrb.gmra.mxu1 %vm994_vm3, %v1149_v0 }
 0x41a   : > { %v1281_v2 = vpop.xlane.xlu2 %1280 }
 0x41b   : > { %2959 = vrcp.f32 %v1281_v2 }
 0x421   : > { %v2960_v35 = vpop.eup %2959 }
 0x422   : > { %v1140_v3 = vpop.f32.mrf.mxu3  ;;  %v1284_v4 = vpop.xlane.xlu2 %1283  ;;  %v1295_v6 = vmul.f32 %v2960_v35, %v2956_v55 }
 0x423   : > { %2961 = vrcp.f32 %v1284_v4 }
 0x424   : > { %v1299_v9 = vpack.c.bf16 %v1295_v6, %v1295_v6 }
 0x426   : > { %v1305_v16 = vunpack.c.l.b16 %v1299_v9 }
 0x429   : > { %v2962_v8 = vpop.eup %2961 }
 0x42a   : > { %v1296_v10 = vmul.f32 %v2962_v8, %v2958_v58  ;;  %v1142_v11 = vpop.f32.mrf.mxu3  ;;  %v1309_v12 = vpop.permute.xlu2 %1308 }
 0x42b   : > { %v1150_v14 = vpack.c.bf16 %v1142_v11, %v1140_v3  ;;  %1321 = vmatpush.bf16.msrb.mxu0 %v1309_v12 }
 0x42c   : > { %v1300_v15 = vpack.c.bf16 %v1296_v10, %v1296_v10 }
 0x42d   : > { %2739 = vmatmul.msk.bf16.gmra.mxu1 %vm994_vm3, %v1150_v14 }
 0x42e   : > { %v1306_v17 = vunpack.c.l.b16 %v1300_v15 }
 0x42f   : > { %1422 = vmatpush.bf16.xpose.msra.mxu0 %v1413_v13 }
 0x430   : > { %v1307_v18 = vpack.c.b16 %v1306_v17, %v1305_v16 }
 0x432   : > { %v1246_v19 = vpop.f32.mrf.mxu3  ;;  %2750 = vmatmul.msk.bf16.vlgmr.msrb.gmra.mxu0 %vm1046_vm4, %v1307_v18 }
 0x433   : > { %v1253_v20 = vmul.f32 0.35355338, %v1246_v19 }
 0x435   : > { %v1261_v21 = vsel %vm1046_vm4, %v1253_v20, -inf }
 0x436   : > { %1262 = vmax.xlane.f32.xlu2 %v1261_v21 }
 0x43a   : > { %v1248_v22 = vpop.f32.mrf.mxu3 }
 0x43b   : > { %v1254_v23 = vmul.f32 0.35355338, %v1248_v22 }
 0x43d   : > { %v1264_v24 = vsel %vm1046_vm4, %v1254_v23, -inf }
 0x43e   : > { %1265 = vmax.xlane.f32.xlu0 %v1264_v24 }
 0x442   : > { %2758 = vmatmul.msk.bf16.vlgmr.msra.gmra.mxu0 %vm994_vm3, %v1406_v25 }
 0x469   : > { %v1171_v27 = vpop.f32.mrf.mxu1 }
 0x46a   : > { %v1181_v28 = vadd.f32 %v1171_v27, %v1145_v26 }
 0x46c   : > { %1185 = vst.msk [vmem:[#allocation4] sm:$0xff] %vm940_vm1, %v1181_v28 }
 0x471   : > { %v1173_v30 = vpop.f32.mrf.mxu1 }
 0x472   : > { %v1182_v31 = vadd.f32 %v1173_v30, %v1146_v29  ;;  %v3471_v29 = vld [vmem:[#allocation3 + $0x8] sm:$0xff] }
 0x473   : > { %v1353_v12 = vld [vmem:[#allocation4] sm:$0xff] }
 0x474   : > { %1186 = vst.msk [vmem:[#allocation4 + $0x8] sm:$0xff] %vm940_vm1, %v1182_v31 }
 0x4a9   : > { %v1263_v36 = vpop.xlane.xlu2 %1262 }
 0x4aa   : > { %v1269_v37 = vsub.f32 %v1253_v20, %v1263_v36  ;;  %v1176_v38 = vpop.f32.mrf.mxu1 }
 0x4ab   : > { %v1183_v39 = vadd.f32 %v1176_v38, %v1147_v34 }
 0x4ac   : > { %v1275_v40 = vmul.f32 1.442695, %v1269_v37 }
 0x4ad   : > { %1187 = vst.msk [vmem:[#allocation4 + $0x10] sm:$0xff] %vm940_vm1, %v1183_v39 }
 0x4ae   : > { %2963 = vpow2.f32 %v1275_v40 }
 0x4af   : > { %v1323_v41 = vpop.f32.mrf.mxu0 }
 0x4b1   : > { %v1266_v43 = vpop.xlane.xlu0 %1265 }
 0x4b2   : > { %v1270_v44 = vsub.f32 %v1254_v23, %v1266_v43  ;;  %v1178_v45 = vpop.f32.mrf.mxu1  ;;  %v1354_v23 = vld [vmem:[#allocation4 + $0x8] sm:$0xff] }
 0x4b3   : > { %v1184_v46 = vadd.f32 %v1178_v45, %v1148_v42 }
 0x4b4   : > { %v2964_v47 = vpop.eup %2963  ;;  %v1277_v48 = vmul.f32 1.442695, %v1270_v44 }
 0x4b5   : > { %1188 = vst.msk [vmem:[#allocation4 + $0x18] sm:$0xff] %vm940_vm1, %v1184_v46  ;;  %v1285_v49 = vsel %vm1046_vm4, %v2964_v47, 0.0 }
 0x4b6   : > { %2965 = vpow2.f32 %v1277_v48  ;;  %1286 = vadd.xlane.f32.xlu1 %v1285_v49 }
 0x4b7   : > { %v1325_v50 = vpop.f32.mrf.mxu0 }
 0x4b8   : > { %v1357_v51 = vpack.c.bf16 %v1325_v50, %v1323_v41 }
 0x4ba   : > { %2752 = vmatmul.msk.bf16.vlgmr.msrb.gmra.mxu3 %vm994_vm3, %v1357_v51 }
 0x4bc   : > { %v2966_v52 = vpop.eup %2965 }
 0x4bd   : > { %v1288_v53 = vsel %vm1046_vm4, %v2966_v52, 0.0 }
 0x4be   : > { %1289 = vadd.xlane.f32.xlu2 %v1288_v53 }
 0x4bf   : > { %v1424_v54 = vpop.f32.mrf.mxu0 }
 0x4c0   : > { %v1458_v55 = vmul.f32 0.35355338, %v1424_v54 }
 0x4c2   : > { %v1462_v56 = vsel %vm1046_vm4, %v1458_v55, -inf }
 0x4c3   : > { %1463 = vmax.xlane.f32.xlu0 %v1462_v56 }
 0x4c7   : > { %v1426_v58 = vpop.f32.mrf.mxu0 }
 0x4c8   : > { %v1459_v59 = vmul.f32 0.35355338, %v1426_v58  ;;  %v1566_v58 = vld [vmem:[%s3294_s2 + $0x8] sm:$0xf] }
 0x4ca   : > { %v1465_v60 = vsel %vm1046_vm4, %v1459_v59, -inf }
 0x4cb   : > { %1466 = vmax.xlane.f32.xlu0 %v1465_v60  ;;  %v1355_v60 = vld [vmem:[#allocation4 + $0x10] sm:$0xff] }
 0x4d6   : > { %1333 = vrot.lane.b32.xlu2 %v3387_v57, %s3137_s27  ;;  %s3872_s27 = scalar_lea.vmem %s3830_s9, %s3279_s29 }
 0x4de   : > { %1436 = vrot.lane.b32.xlu2 %v3450_v61, %s3136_s6 }
 0x4df   : > { %1434 = vrot.lane.b32.xlu0 %v3450_v61, %s3135_s25  ;;  %s3875_s25 = sld [smem:[#allocation22_spill]] (!%p2828_p9) }
 0x4e6   : > { %1614 = vrot.lane.b32.xlu2 %v3456_v62, %s3138_s28 }
 0x4ee   : > { %1612 = vrot.lane.b32.xlu2 %v3456_v62, %s3139_s30 }
 0x529   : > { %v1287_v63 = vpop.xlane.xlu1 %1286 }
 0x52a   : > { %2967 = vrcp.f32 %v1287_v63 }
 0x530   : > { %v2968_v0 = vpop.eup %2967 }
 0x531   : > { %v1290_v57 = vpop.xlane.xlu2 %1289  ;;  %v1297_v2 = vmul.f32 %v2968_v0, %v2964_v47 }
 0x532   : > { %2969 = vrcp.f32 %v1290_v57 }
 0x533   : > { %v1301_v35 = vpack.c.bf16 %v1297_v2, %v1297_v2 }
 0x535   : > { %v1330_v10 = vunpack.c.l.b16 %v1301_v35 }
 0x536   : > { %v1464_v3 = vpop.xlane.xlu0 %1463 }
 0x537   : > { %v1474_v4 = vsub.f32 %v1458_v55, %v1464_v3  ;;  %v1356_v3 = vld [vmem:[#allocation4 + $0x18] sm:$0xff] }
 0x538   : > { %v2970_v5 = vpop.eup %2969 }
 0x539   : > { %v1298_v6 = vmul.f32 %v2970_v5, %v2966_v52  ;;  %v1478_v7 = vmul.f32 1.442695, %v1474_v4  ;;  %v1334_v8 = vpop.permute.xlu2 %1333 }
 0x53a   : > { %1346 = vmatpush.bf16.msrb.mxu2 %v1334_v8 }
 0x53b   : > { %v1302_v9 = vpack.c.bf16 %v1298_v6, %v1298_v6  ;;  %2971 = vpow2.f32 %v1478_v7 }
 0x53d   : > { %v1331_v11 = vunpack.c.l.b16 %v1302_v9  ;;  %v1378_v13 = vpop.f32.mrf.mxu3 }
 0x53e   : > { %v1388_v14 = vadd.f32 %v1378_v13, %v1353_v12  ;;  %v1467_v15 = vpop.xlane.xlu0 %1466 }
 0x53f   : > { %v1332_v16 = vpack.c.b16 %v1331_v11, %v1330_v10  ;;  %v1475_v17 = vsub.f32 %v1459_v59, %v1467_v15  ;;  %v1574_v59 = vsel %vm1158_vm5, %v1566_v58, 0 }
 0x540   : > { %1392 = vst.msk [vmem:[#allocation4] sm:$0xff] %vm940_vm1, %v1388_v14 }
 0x541   : > { %v2972_v18 = vpop.eup %2971  ;;  %v1480_v19 = vmul.f32 1.442695, %v1475_v17  ;;  %v1437_v20 = vpop.permute.xlu2 %1436  ;;  %2751 = vmatmul.msk.bf16.vlgmr.msrb.gmra.mxu2 %vm1046_vm4, %v1332_v16 }
 0x542   : > { %v1442_v21 = vsel %vm994_vm3, %v1437_v20, 0  ;;  %v1486_v22 = vsel %vm1046_vm4, %v2972_v18, 0.0 }
 0x543   : > { %2973 = vpow2.f32 %v1480_v19  ;;  %1451 = vmatpush.bf16.xpose.msra.mxu1 %v1442_v21  ;;  %1487 = vadd.xlane.f32.xlu1 %v1486_v22 }
 0x545   : > { %v1380_v24 = vpop.f32.mrf.mxu3 }
 0x546   : > { %v1389_v25 = vadd.f32 %v1380_v24, %v1354_v23 }
 0x548   : > { %1393 = vst.msk [vmem:[#allocation4 + $0x8] sm:$0xff] %vm940_vm1, %v1389_v25 }
 0x549   : > { %v2974_v26 = vpop.eup %2973 }
 0x54a   : > { %v1489_v27 = vsel %vm1046_vm4, %v2974_v26, 0.0 }
 0x54b   : > { %1490 = vadd.xlane.f32.xlu0 %v1489_v27  ;;  %1583 = vmatpush.bf16.msrb.mxu1 %v1574_v59 }
 0x551   : > { %v1435_v28 = vpop.permute.xlu0 %1434 }
 0x552   : > { %2763 = vmatmul.msk.bf16.vlgmr.msra.gmra.mxu1 %vm994_vm3, %v1435_v28 }
 0x55c   : > { %1515 = vrot.lane.b32.xlu1 %v3395_v1, %s3140_s18  ;;  %v1615_v1 = vpop.permute.xlu2 %1614 }
 0x55d   : > { %v1620_v45 = vsel %vm994_vm3, %v1615_v1, 0 }
 0x55f   : > { %1641 = vrot.lane.b32.xlu0 %v3471_v29, %s3139_s30 }
 0x564   : > { %1643 = vrot.lane.b32.xlu1 %v3471_v29, %s3138_s28  ;;  %v1613_v56 = vpop.permute.xlu2 %1612 }
 0x5b6   : > { %v1488_v30 = vpop.xlane.xlu1 %1487 }
 0x5b7   : > { %2975 = vrcp.f32 %v1488_v30 }
 0x5bd   : > { %v2976_v32 = vpop.eup %2975 }
 0x5be   : > { %v1491_v31 = vpop.xlane.xlu0 %1490  ;;  %v1502_v36 = vmul.f32 %v2976_v32, %v2972_v18  ;;  %v1560_v32 = vld [vmem:[#allocation4] sm:$0xff] }
 0x5bf   : > { %2977 = vrcp.f32 %v1491_v31 }
 0x5c0   : > { %v1506_v39 = vpack.c.bf16 %v1502_v36, %v1502_v36 }
 0x5c2   : > { %v1512_v43 = vunpack.c.l.b16 %v1506_v39 }
 0x5c4   : > { %v1348_v33 = vpop.f32.mrf.mxu2 }
 0x5c5   : > { %v2978_v34 = vpop.eup %2977 }
 0x5c6   : > { %v1503_v37 = vmul.f32 %v2978_v34, %v2974_v26 }
 0x5c8   : > { %v1507_v38 = vpack.c.bf16 %v1503_v37, %v1503_v37 }
 0x5ca   : > { %v1513_v40 = vunpack.c.l.b16 %v1507_v38 }
 0x5cc   : > { %v1350_v41 = vpop.f32.mrf.mxu2  ;;  %v1514_v47 = vpack.c.b16 %v1513_v40, %v1512_v43 }
 0x5cd   : > { %v1358_v42 = vpack.c.bf16 %v1350_v41, %v1348_v33 }
 0x5ce   : > { %v1516_v44 = vpop.permute.xlu1 %1515 }
 0x5cf   : > { %2753 = vmatmul.msk.bf16.gmra.mxu3 %vm994_vm3, %v1358_v42  ;;  %v1453_v46 = vpop.f32.mrf.mxu1  ;;  %1528 = vmatpush.bf16.msra.mxu2 %v1516_v44  ;;  %v1561_v42 = vld [vmem:[#allocation4 + $0x8] sm:$0xff] }
 0x5d0   : > { %v1460_v48 = vmul.f32 0.35355338, %v1453_v46 }
 0x5d1   : > { %v1642_v55 = vpop.permute.xlu0 %1641 }
 0x5d2   : > { %2764 = vmatmul.msk.bf16.vlgmr.msra.gmra.mxu2 %vm1046_vm4, %v1514_v47  ;;  %v1468_v49 = vsel %vm1046_vm4, %v1460_v48, -inf }
 0x5d3   : > { %1629 = vmatpush.bf16.xpose.msrb.mxu2 %v1620_v45  ;;  %1469 = vmax.xlane.f32.xlu2 %v1468_v49 }
 0x5d6   : > { %v1644_v50 = vpop.permute.xlu1 %1643 }
 0x5d7   : > { %v1649_v51 = vsel %vm994_vm3, %v1644_v50, 0  ;;  %v1455_v52 = vpop.f32.mrf.mxu1 }
 0x5d8   : > { %v1461_v53 = vmul.f32 0.35355338, %v1455_v52  ;;  %1658 = vmatpush.bf16.xpose.msra.mxu3 %v1649_v51 }
 0x5da   : > { %v1471_v54 = vsel %vm1046_vm4, %v1461_v53, -inf }
 0x5db   : > { %1472 = vmax.xlane.f32.xlu1 %v1471_v54 }
 0x5df   : > { %2777 = vmatmul.msk.bf16.vlgmr.msra.gmra.mxu3 %vm994_vm3, %v1642_v55 }
 0x5e2   : > { %2772 = vmatmul.msk.bf16.vlgmr.msrb.gmra.mxu2 %vm994_vm3, %v1613_v56 }
 0x646   : > { %v1470_v35 = vpop.xlane.xlu2 %1469 }
 0x647   : > { %v1476_v9 = vsub.f32 %v1460_v48, %v1470_v35 }
 0x649   : > { %v1482_v12 = vmul.f32 1.442695, %v1476_v9 }
 0x64e   : > { %v1473_v2 = vpop.xlane.xlu1 %1472 }
 0x64f   : > { %v1477_v6 = vsub.f32 %v1461_v53, %v1473_v2 }
 0x651   : > { %v1484_v10 = vmul.f32 1.442695, %v1477_v6 }
 0x652   : > { %v1383_v63 = vpop.f32.mrf.mxu3 }
 0x653   : > { %v1390_v57 = vadd.f32 %v1383_v63, %v1355_v60  ;;  %2979 = vpow2.f32 %v1484_v10 }
 0x654   : > { %2981 = vpow2.f32 %v1482_v12 }
 0x655   : > { %1394 = vst.msk [vmem:[#allocation4 + $0x10] sm:$0xff] %vm940_vm1, %v1390_v57  ;;  %v1530_v0 = vpop.f32.mrf.mxu2 }
 0x659   : > { %v2980_v18 = vpop.eup %2979 }
 0x65a   : > { %v1385_v4 = vpop.f32.mrf.mxu3  ;;  %v2982_v19 = vpop.eup %2981  ;;  %v1495_v21 = vsel %vm1046_vm4, %v2980_v18, 0.0 }
 0x65b   : > { %v1391_v5 = vadd.f32 %v1385_v4, %v1356_v3  ;;  %v1492_v23 = vsel %vm1046_vm4, %v2982_v19, 0.0 }
 0x65d   : > { %1395 = vst.msk [vmem:[#allocation4 + $0x18] sm:$0xff] %vm940_vm1, %v1391_v5  ;;  %v1532_v7 = vpop.f32.mrf.mxu2 }
 0x65e   : > { %v1564_v8 = vpack.c.bf16 %v1532_v7, %v1530_v0 }
 0x660   : > { %2766 = vmatmul.msk.bf16.vlgmr.msrb.gmra.mxu1 %vm994_vm3, %v1564_v8 }
 0x662   : > { %v1660_v11 = vpop.f32.mrf.mxu3 }
 0x663   : > { %v1667_v13 = vmul.f32 0.35355338, %v1660_v11 }
 0x665   : > { %v1631_v14 = vpop.f32.mrf.mxu2  ;;  %v1675_v15 = vsel %vm1046_vm4, %v1667_v13, -inf }
 0x666   : > { %v1665_v16 = vmul.f32 0.35355338, %v1631_v14  ;;  %1676 = vmax.xlane.f32.xlu1 %v1675_v15 }
 0x668   : > { %v1669_v17 = vsel %vm1046_vm4, %v1665_v16, -inf }
 0x669   : > { %1670 = vmax.xlane.f32.xlu0 %v1669_v17 }
 0x66a   : > { %v1662_v25 = vpop.f32.mrf.mxu3 }
 0x66b   : > { %v1668_v26 = vmul.f32 0.35355338, %v1662_v25 }
 0x66d   : > { %v1633_v20 = vpop.f32.mrf.mxu2  ;;  %v1678_v27 = vsel %vm1046_vm4, %v1668_v26, -inf }
 0x66e   : > { %v1666_v22 = vmul.f32 0.35355338, %v1633_v20  ;;  %1496 = vadd.xlane.f32.xlu1 %v1495_v21 }
 0x670   : > { %v1672_v24 = vsel %vm1046_vm4, %v1666_v22, -inf }
 0x671   : > { %1493 = vadd.xlane.f32.xlu0 %v1492_v23  ;;  %1673 = vmax.xlane.f32.xlu2 %v1672_v24 }
 0x679   : > { %1679 = vmax.xlane.f32.xlu2 %v1678_v27 }
 0x691   : > { %1540 = vrot.lane.b32.xlu2 %v3450_v61, %s3140_s18 }
 0x6d9   : > { %v1677_v28 = vpop.xlane.xlu1 %1676 }
 0x6da   : > { %v1683_v36 = vsub.f32 %v1667_v13, %v1677_v28 }
 0x6dc   : > { %v1671_v30 = vpop.xlane.xlu0 %1670  ;;  %v1689_v39 = vmul.f32 1.442695, %v1683_v36 }
 0x6dd   : > { %v1681_v31 = vsub.f32 %v1665_v16, %v1671_v30  ;;  %v1585_v33 = vpop.f32.mrf.mxu1  ;;  %v1773_v30 = vld [vmem:[%s3294_s2 + $0xc] sm:$0xf] }
 0x6de   : > { %v1595_v34 = vadd.f32 %v1585_v33, %v1560_v32  ;;  %v1562_v33 = vld [vmem:[#allocation4 + $0x10] sm:$0xff] }
 0x6df   : > { %v1685_v37 = vmul.f32 1.442695, %v1681_v31  ;;  %v1781_v31 = vsel %vm1158_vm5, %v1773_v30, 0 }
 0x6e0   : > { %1599 = vst.msk [vmem:[#allocation4] sm:$0xff] %vm940_vm1, %v1595_v34  ;;  %1790 = vmatpush.bf16.msrb.mxu3 %v1781_v31  ;;  %v2859_v31 = vld [vmem:[%s3303_s16] sm:$0xff] }
 0x6e1   : > { %2983 = vpow2.f32 %v1685_v37  ;;  %v1497_v38 = vpop.xlane.xlu1 %1496 }
 0x6e2   : > { %2985 = vrcp.f32 %v1497_v38 }
 0x6e4   : > { %v1494_v1 = vpop.xlane.xlu0 %1493  ;;  %v1674_v40 = vpop.xlane.xlu2 %1673 }
 0x6e5   : > { %2987 = vrcp.f32 %v1494_v1  ;;  %v1682_v41 = vsub.f32 %v1666_v22, %v1674_v40  ;;  %v1587_v61 = vpop.f32.mrf.mxu1 }
 0x6e6   : > { %v1596_v43 = vadd.f32 %v1587_v61, %v1561_v42  ;;  %2989 = vpow2.f32 %v1689_v39  ;;  %v1563_v39 = vld [vmem:[#allocation4 + $0x18] sm:$0xff] }
 0x6e7   : > { %v2984_v44 = vpop.eup %2983  ;;  %v1687_v45 = vmul.f32 1.442695, %v1682_v41 }
 0x6e8   : > { %1600 = vst.msk [vmem:[#allocation4 + $0x8] sm:$0xff] %vm940_vm1, %v1596_v43  ;;  %v1693_v46 = vsel %vm1046_vm4, %v2984_v44, 0.0  ;;  %v2986_v47 = vpop.eup %2985  ;;  %v1767_v43 = vld [vmem:[#allocation4] sm:$0xff] }
 0x6e9   : > { %2991 = vpow2.f32 %v1687_v45  ;;  %1694 = vadd.xlane.f32.xlu0 %v1693_v46  ;;  %v1505_v49 = vmul.f32 %v2986_v47, %v2980_v18 }
 0x6eb   : > { %v2988_v48 = vpop.eup %2987  ;;  %v1509_v58 = vpack.c.bf16 %v1505_v49, %v1505_v49 }
 0x6ec   : > { %v1504_v50 = vmul.f32 %v2988_v48, %v2982_v19  ;;  %v1680_v51 = vpop.xlane.xlu2 %1679  ;;  %v2990_v52 = vpop.eup %2989 }
 0x6ed   : > { %v1684_v53 = vsub.f32 %v1668_v26, %v1680_v51  ;;  %v1699_v60 = vsel %vm1046_vm4, %v2990_v52, 0.0  ;;  %v1538_v57 = vunpack.c.l.b16 %v1509_v58 }
 0x6ee   : > { %v1508_v54 = vpack.c.bf16 %v1504_v50, %v1504_v50  ;;  %v3029_v50 = vld [vmem:[#allocation2] sm:$0xff] }
 0x6ef   : > { %v2992_v55 = vpop.eup %2991  ;;  %v1691_v56 = vmul.f32 1.442695, %v1684_v53  ;;  %v1768_v46 = vld [vmem:[#allocation4 + $0x8] sm:$0xff] }
 0x6f0   : > { %v1696_v59 = vsel %vm1046_vm4, %v2992_v55, 0.0  ;;  %v1537_v63 = vunpack.c.l.b16 %v1508_v54 }
 0x6f1   : > { %2993 = vpow2.f32 %v1691_v56  ;;  %1697 = vadd.xlane.f32.xlu1 %v1696_v59  ;;  %1700 = vadd.xlane.f32.xlu0 %v1699_v60  ;;  %v3030_v59 = vld [vmem:[#allocation2 + $0x8] sm:$0xff] }
 0x6f2   : > { %v1539_v2 = vpack.c.b16 %v1538_v57, %v1537_v63 }
 0x6f4   : > { %v1541_v0 = vpop.permute.xlu2 %1540 }
 0x6f5   : > { %1553 = vmatpush.bf16.msrb.mxu0 %v1541_v0 }
 0x6f7   : > { %v2994_v3 = vpop.eup %2993 }
 0x6f8   : > { %2765 = vmatmul.msk.bf16.vlgmr.msrb.gmra.mxu0 %vm1046_vm4, %v1539_v2  ;;  %v1702_v4 = vsel %vm1046_vm4, %v2994_v3, 0.0 }
 0x6f9   : > { %1703 = vadd.xlane.f32.xlu1 %v1702_v4 }
 0x705   : > { %1722 = vrot.lane.b32.xlu0 %v3456_v62, %s3141_s21 }
 0x712   : > { %1747 = vrot.lane.b32.xlu1 %v3471_v29, %s3141_s21 }
 0x75c   : > { %v1695_v5 = vpop.xlane.xlu0 %1694 }
 0x75d   : > { %2995 = vrcp.f32 %v1695_v5 }
 0x763   : > { %v2996_v6 = vpop.eup %2995 }
 0x764   : > { %v1698_v35 = vpop.xlane.xlu1 %1697  ;;  %v1709_v10 = vmul.f32 %v2996_v6, %v2984_v44  ;;  %v1701_v11 = vpop.xlane.xlu0 %1700  ;;  %v3031_v6 = vld [vmem:[#allocation2 + $0x10] sm:$0xff] }
 0x765   : > { %2997 = vrcp.f32 %v1698_v35 }
 0x766   : > { %v1713_v13 = vpack.c.bf16 %v1709_v10, %v1709_v10 }
 0x768   : > { %v1719_v62 = vunpack.c.l.b16 %v1713_v13 }
 0x76b   : > { %v2998_v7 = vpop.eup %2997 }
 0x76c   : > { %v1710_v8 = vmul.f32 %v2998_v7, %v2992_v55  ;;  %v1704_v9 = vpop.xlane.xlu1 %1703 }
 0x76d   : > { %2999 = vrcp.f32 %v1704_v9 }
 0x76e   : > { %v1714_v12 = vpack.c.bf16 %v1710_v8, %v1710_v8  ;;  %3001 = vrcp.f32 %v1701_v11  ;;  %v3032_v11 = vld [vmem:[#allocation2 + $0x18] sm:$0xff] }
 0x770   : > { %v1720_v14 = vunpack.c.l.b16 %v1714_v12 }
 0x772   : > { %v1721_v18 = vpack.c.b16 %v1720_v14, %v1719_v62  ;;  %v3142_v62 = vmov 32.0  }
 0x773   : > { %v3000_v16 = vpop.eup %2999  ;;  %3003 = vrcp.f32 %v3142_v62 }
 0x774   : > { %v3002_v29 = vpop.eup %3001  ;;  %v1712_v19 = vmul.f32 %v3000_v16, %v2994_v3 }
 0x775   : > { %v1555_v15 = vpop.f32.mrf.mxu0  ;;  %v1711_v20 = vmul.f32 %v3002_v29, %v2990_v52 }
 0x776   : > { %v1716_v22 = vpack.c.bf16 %v1712_v19, %v1712_v19 }
 0x777   : > { %v1723_v17 = vpop.permute.xlu0 %1722  ;;  %v1715_v24 = vpack.c.bf16 %v1711_v20, %v1711_v20 }
 0x778   : > { %1735 = vmatpush.bf16.msra.mxu0 %v1723_v17  ;;  %v1745_v25 = vunpack.c.l.b16 %v1716_v22 }
 0x779   : > { %v1744_v26 = vunpack.c.l.b16 %v1715_v24  ;;  %v3004_v17 = vpop.eup %3003 }
 0x77a   : > { %v1833_v29 = vmul.f32 32.0, %v3004_v17  ;;  %vm1837_vm6 = vweird.f32 %v3004_v17 }
 0x77b   : > { %2778 = vmatmul.msk.bf16.vlgmr.msra.gmra.mxu0 %vm1046_vm4, %v1721_v18  ;;  %v1746_v28 = vpack.c.b16 %v1745_v25, %v1744_v26 }
 0x77c   : > { %v1834_v18 = vsub.f32 1.0, %v1833_v29 }
 0x77d   : > { %v1557_v21 = vpop.f32.mrf.mxu0 }
 0x77e   : > { %v1565_v23 = vpack.c.bf16 %v1557_v21, %v1555_v15  ;;  %v1835_v19 = vmul.f32 %v3004_v17, %v1834_v18 }
 0x780   : > { %2767 = vmatmul.msk.bf16.gmra.mxu1 %vm994_vm3, %v1565_v23  ;;  %v1836_v20 = vadd.f32 %v3004_v17, %v1835_v19 }
 0x782   : > { %v3548_v21 = vsel %vm1837_vm6, %v3004_v17, %v1836_v20 }
 0x784   : > { %v1748_v27 = vpop.permute.xlu1 %1747 }
 0x785   : > { %1760 = vmatpush.bf16.msra.mxu2 %v1748_v27  ;;  %v2860_v27 = vld [vmem:[%s3303_s16 + $0x8] sm:$0xff]  ;;  %s3874_s16 = sld [smem:[#allocation21_spill]] (!%p2828_p9) }
 0x786   : > { %1971 = vmatpush.bf16.msrb.mxu0 %v2860_v27 }
 0x788   : > { %2779 = vmatmul.msk.bf16.vlgmr.msra.gmra.mxu2 %vm1046_vm4, %v1746_v28 }
 0x78a   : > { %1972 = vmatpush.bf16.msrb.mxu0 %v2859_v31 }
 0x7f8   : > { %v1737_v32 = vpop.f32.mrf.mxu0 }
 0x7fd   : > { %v1590_v34 = vpop.f32.mrf.mxu1 }
 0x7fe   : > { %v1597_v36 = vadd.f32 %v1590_v34, %v1562_v33 }
 0x800   : > { %1601 = vst.msk [vmem:[#allocation4 + $0x10] sm:$0xff] %vm940_vm1, %v1597_v36  ;;  %v1739_v37 = vpop.f32.mrf.mxu0 }
 0x801   : > { %v1771_v38 = vpack.c.bf16 %v1739_v37, %v1737_v32 }
 0x803   : > { %2780 = vmatmul.msk.bf16.vlgmr.msrb.gmra.mxu3 %vm994_vm3, %v1771_v38 }
 0x805   : > { %v1592_v1 = vpop.f32.mrf.mxu1 }
 0x806   : > { %v1598_v40 = vadd.f32 %v1592_v1, %v1563_v39 }
 0x807   : > { %v1769_v56 = vld [vmem:[#allocation4 + $0x10] sm:$0xff] }
 0x808   : > { %1602 = vst.msk [vmem:[#allocation4 + $0x18] sm:$0xff] %vm940_vm1, %v1598_v40 }
 0x80b   : > { %v1762_v41 = vpop.f32.mrf.mxu2 }
 0x80f   : > { %v1770_v3 = vld [vmem:[#allocation4 + $0x18] sm:$0xff] }
 0x813   : > { %v1764_v42 = vpop.f32.mrf.mxu2 }
 0x814   : > { %v1772_v61 = vpack.c.bf16 %v1764_v42, %v1762_v41 }
 0x816   : > { %2781 = vmatmul.msk.bf16.gmra.mxu3 %vm994_vm3, %v1772_v61 }
 0x886   : > { %v1792_v44 = vpop.f32.mrf.mxu3 }
 0x887   : > { %v1802_v45 = vadd.f32 %v1792_v44, %v1767_v43 }
 0x889   : > { %1806 = vst.msk [vmem:[#allocation4] sm:$0xff] %vm940_vm1, %v1802_v45 }
 0x88e   : > { %v1794_v47 = vpop.f32.mrf.mxu3 }
 0x88f   : > { %v1803_v48 = vadd.f32 %v1794_v47, %v1768_v46 }
 0x890   : > { %v1810_v49 = vld [vmem:[#allocation4] sm:$0xff] }
 0x891   : > { %1807 = vst.msk [vmem:[#allocation4 + $0x8] sm:$0xff] %vm940_vm1, %v1803_v48  ;;  %v3518_v51 = vadd.f32 %v3029_v50, %v1810_v49  ;;  %v2933_v49 = vld [vmem:[%s832_s17] ss:$0 sm:$0xff] }
 0x893   : > { %v1820_v52 = vsel %vm940_vm1, %v3518_v51, 0.0  ;;  %v1843_v53 = vmul.f32 %v3518_v51, %v3518_v51 }
 0x894   : > { %1821 = vadd.xlane.f32.xlu2 %v1820_v52 }
 0x895   : > { %v1847_v54 = vsel %vm940_vm1, %v1843_v53, 0.0 }
 0x896   : > { %1848 = vadd.xlane.f32.xlu1 %v1847_v54 }
 0x898   : > { %v1811_v55 = vld [vmem:[#allocation4 + $0x8] sm:$0xff] }
 0x899   : > { %v1797_v58 = vpop.f32.mrf.mxu3  ;;  %v3525_v60 = vadd.f32 %v3030_v59, %v1811_v55 }
 0x89a   : > { %v1804_v63 = vadd.f32 %v1797_v58, %v1769_v56 }
 0x89b   : > { %v1823_v57 = vsel %vm940_vm1, %v3525_v60, 0.0  ;;  %v1844_v0 = vmul.f32 %v3525_v60, %v3525_v60 }
 0x89c   : > { %1808 = vst.msk [vmem:[#allocation4 + $0x10] sm:$0xff] %vm940_vm1, %v1804_v63  ;;  %1824 = vadd.xlane.f32.xlu0 %v1823_v57 }
 0x89d   : > { %v1850_v2 = vsel %vm940_vm1, %v1844_v0, 0.0 }
 0x89e   : > { %1851 = vadd.xlane.f32.xlu2 %v1850_v2 }
 0x8a1   : > { %v1799_v4 = vpop.f32.mrf.mxu3 }
 0x8a2   : > { %v1805_v5 = vadd.f32 %v1799_v4, %v1770_v3 }
 0x8a3   : > { %v1812_v35 = vld [vmem:[#allocation4 + $0x10] sm:$0xff] }
 0x8a4   : > { %1809 = vst.msk [vmem:[#allocation4 + $0x18] sm:$0xff] %vm940_vm1, %v1805_v5  ;;  %v3534_v7 = vadd.f32 %v3031_v6, %v1812_v35 }
 0x8a6   : > { %v1826_v8 = vsel %vm940_vm1, %v3534_v7, 0.0  ;;  %v1845_v9 = vmul.f32 %v3534_v7, %v3534_v7 }
 0x8a7   : > { %1827 = vadd.xlane.f32.xlu2 %v1826_v8 }
 0x8a8   : > { %v1853_v13 = vsel %vm940_vm1, %v1845_v9, 0.0  ;;  %v2934_v9 = vld [vmem:[%s835_s8] ss:$0 sm:$0xff] }
 0x8ab   : > { %v1813_v10 = vld [vmem:[#allocation4 + $0x18] sm:$0xff] }
 0x8ac   : > { %v3540_v12 = vadd.f32 %v3032_v11, %v1813_v10 }
 0x8ae   : > { %v1829_v14 = vsel %vm940_vm1, %v3540_v12, 0.0  ;;  %v1846_v15 = vmul.f32 %v3540_v12, %v3540_v12 }
 0x8af   : > { %1854 = vadd.xlane.f32.xlu2 %v1853_v13  ;;  %1830 = vadd.xlane.f32.xlu0 %v1829_v14 }
 0x8b0   : > { %v1856_v16 = vsel %vm940_vm1, %v1846_v15, 0.0 }
 0x8b7   : > { %1857 = vadd.xlane.f32.xlu0 %v1856_v16 }
 0x907   : > { %v1822_v22 = vpop.xlane.xlu2 %1821 }
 0x908   : > { %v1839_v23 = vmul.f32 %v3548_v21, %v1822_v22 }
 0x909   : > { %v1849_v24 = vpop.xlane.xlu1 %1848 }
 0x90a   : > { %v1863_v25 = vmul.f32 %v1839_v23, %v1839_v23  ;;  %v1859_v26 = vmul.f32 %v1849_v24, %v3548_v21  ;;  %v1922_v3 = vsub.f32 %v3518_v51, %v1839_v23 }
 0x90c   : > { %v1867_v28 = vsub.f32 %v1859_v26, %v1863_v25 }
 0x90e   : > { %v1871_v30 = vadd.f32 1e-05, %v1867_v28 }
 0x90f   : > { %v1825_v32 = vpop.xlane.xlu0 %1824 }
 0x910   : > { %3005 = vrsqrt.f32 %v1871_v30  ;;  %v1840_v33 = vmul.f32 %v3548_v21, %v1825_v32  ;;  %vm1881_vm8 = vweird.f32 %v1871_v30 }
 0x911   : > { %v1852_v34 = vpop.xlane.xlu2 %1851 }
 0x912   : > { %v1864_v36 = vmul.f32 %v1840_v33, %v1840_v33  ;;  %v1860_v37 = vmul.f32 %v1852_v34, %v3548_v21  ;;  %v1923_v35 = vsub.f32 %v3525_v60, %v1840_v33 }
 0x914   : > { %v1868_v38 = vsub.f32 %v1860_v37, %v1864_v36 }
 0x916   : > { %v3006_v39 = vpop.eup %3005  ;;  %v1872_v1 = vadd.f32 1e-05, %v1868_v38 }
 0x917   : > { %v1876_v40 = vmul.f32 %v3006_v39, %v1871_v30  ;;  %vm1882_vm7 = vweird.f32 %v3006_v39 }
 0x918   : > { %3007 = vrsqrt.f32 %v1872_v1  ;;  %vm1883_vm9 = vmor %vm1881_vm8, %vm1882_vm7  ;;  %vm1891_vm11 = vweird.f32 %v1872_v1 }
 0x919   : > { %v1877_v41 = vmul.f32 %v3006_v39, %v1876_v40 }
 0x91a   : > { %v1828_v42 = vpop.xlane.xlu2 %1827 }
 0x91b   : > { %v1878_v61 = vmul.f32 0.5, %v1877_v41  ;;  %v3557_v47 = vmul.f32 %v3548_v21, %v1828_v42  ;;  %v2868_v41 = vld [vmem:[%s3313_s24 + $0x38] sm:$0xff] }
 0x91c   : > { %2230 = vmatpush.bf16.msra.mxu1 %v2868_v41 }
 0x91d   : > { %v1879_v43 = vsub.f32 1.5, %v1878_v61  ;;  %v1865_v55 = vmul.f32 %v3557_v47, %v3557_v47  ;;  %v1924_v31 = vsub.f32 %v3534_v7, %v3557_v47  ;;  %v3598_v7 = vld [vmem:[%s3872_s27] ss:$0 sm:$0xff]  ;;  %s3876_s27 = sld [smem:[#allocation24_spill]] (!%p2828_p9) }
 0x91e   : > { %v3008_v44 = vpop.eup %3007 }
 0x91f   : > { %v1880_v45 = vmul.f32 %v3006_v39, %v1879_v43  ;;  %v1886_v46 = vmul.f32 %v3008_v44, %v1872_v1  ;;  %vm1892_vm10 = vweird.f32 %v3008_v44  ;;  %v2867_v43 = vld [vmem:[%s3313_s24 + $0x30] sm:$0xff] }
 0x920   : > { %vm1893_vm12 = vmor %vm1891_vm11, %vm1892_vm10  ;;  %2231 = vmatpush.bf16.msra.mxu1 %v2867_v43 }
 0x921   : > { %v1887_v48 = vmul.f32 %v3008_v44, %v1886_v46  ;;  %v1884_v53 = vsel %vm1883_vm9, %v3006_v39, %v1880_v45 }
 0x922   : > { %v1855_v50 = vpop.xlane.xlu2 %1854  ;;  %v1831_v52 = vpop.xlane.xlu0 %1830  ;;  %v1918_v63 = vmul.f32 %v2933_v49, %v1884_v53 }
 0x923   : > { %v1888_v54 = vmul.f32 0.5, %v1887_v48  ;;  %v1861_v56 = vmul.f32 %v1855_v50, %v3548_v21  ;;  %v1842_v2 = vmul.f32 %v3548_v21, %v1831_v52 }
 0x924   : > { %v1926_v5 = vmul.f32 %v1922_v3, %v1918_v63  ;;  %v2864_v3 = vld [vmem:[%s3313_s24 + $0x18] sm:$0xff] }
 0x925   : > { %v1889_v58 = vsub.f32 1.5, %v1888_v54  ;;  %v1869_v59 = vsub.f32 %v1861_v56, %v1865_v55  ;;  %v1866_v10 = vmul.f32 %v1842_v2, %v1842_v2  ;;  %v1925_v33 = vsub.f32 %v3540_v12, %v1842_v2  ;;  %v2865_v56 = vld [vmem:[%s3313_s24 + $0x20] sm:$0xff] }
 0x926   : > { %v3576_v15 = vadd.f32 %v2934_v9, %v1926_v5 }
 0x927   : > { %v1890_v57 = vmul.f32 %v3008_v44, %v1889_v58  ;;  %v1873_v0 = vadd.f32 1e-05, %v1869_v59 }
 0x929   : > { %v1894_v4 = vsel %vm1893_vm12, %v3008_v44, %v1890_v57  ;;  %3009 = vrsqrt.f32 %v1873_v0  ;;  %vm1901_vm14 = vweird.f32 %v1873_v0 }
 0x92a   : > { %v1919_v6 = vmul.f32 %v2933_v49, %v1894_v4  ;;  %v1858_v8 = vpop.xlane.xlu0 %1857 }
 0x92b   : > { %v1862_v11 = vmul.f32 %v1858_v8, %v3548_v21 }
 0x92c   : > { %v1927_v13 = vmul.f32 %v1923_v35, %v1919_v6 }
 0x92d   : > { %v1870_v14 = vsub.f32 %v1862_v11, %v1866_v10  ;;  %v2863_v11 = vld [vmem:[%s3313_s24 + $0x10] sm:$0xff] }
 0x92e   : > { %v3578_v51 = vadd.f32 %v2934_v9, %v1927_v13 }
 0x92f   : > { %v3010_v16 = vpop.eup %3009  ;;  %v1874_v62 = vadd.f32 1e-05, %v1870_v14 }
 0x930   : > { %v1896_v17 = vmul.f32 %v3010_v16, %v1873_v0  ;;  %v1937_v60 = vpack.c.bf16 %v3578_v51, %v3576_v15  ;;  %vm1902_vm13 = vweird.f32 %v3010_v16 }
 0x931   : > { %3011 = vrsqrt.f32 %v1874_v62  ;;  %vm1903_vm15 = vmor %vm1901_vm14, %vm1902_vm13  ;;  %vm1911_vm2 = vweird.f32 %v1874_v62 }
 0x932   : > { %v1897_v29 = vmul.f32 %v3010_v16, %v1896_v17  ;;  %2790 = vmatmul.msk.bf16.vlgmr.msrb.gmra.mxu0 %vm940_vm1, %v1937_v60 }
 0x934   : > { %v1898_v18 = vmul.f32 0.5, %v1897_v29 }
 0x936   : > { %v1899_v19 = vsub.f32 1.5, %v1898_v18 }
 0x937   : > { %v3012_v20 = vpop.eup %3011 }
 0x938   : > { %v1900_v22 = vmul.f32 %v3010_v16, %v1899_v19  ;;  %v1906_v23 = vmul.f32 %v3012_v20, %v1874_v62  ;;  %vm1912_vm0 = vweird.f32 %v3012_v20  ;;  %v2862_v19 = vld [vmem:[%s3313_s24 + $0x8] sm:$0xff] }
 0x939   : > { %vm1913_vm3 = vmor %vm1911_vm2, %vm1912_vm0 }
 0x93a   : > { %v1907_v24 = vmul.f32 %v3012_v20, %v1906_v23  ;;  %v1904_v25 = vsel %vm1903_vm15, %v3010_v16, %v1900_v22 }
 0x93b   : > { %v1920_v28 = vmul.f32 %v2933_v49, %v1904_v25 }
 0x93c   : > { %v1908_v26 = vmul.f32 0.5, %v1907_v24 }
 0x93d   : > { %v1928_v36 = vmul.f32 %v1924_v31, %v1920_v28 }
 0x93e   : > { %v1909_v27 = vsub.f32 1.5, %v1908_v26 }
 0x93f   : > { %v3586_v38 = vadd.f32 %v2934_v9, %v1928_v36 }
 0x940   : > { %v1910_v30 = vmul.f32 %v3012_v20, %v1909_v27  ;;  %v2861_v27 = vld [vmem:[%s3313_s24] sm:$0xff] }
 0x942   : > { %v1914_v32 = vsel %vm1913_vm3, %v3012_v20, %v1910_v30 }
 0x943   : > { %v1921_v34 = vmul.f32 %v2933_v49, %v1914_v32  ;;  %v2866_v49 = vld [vmem:[%s3313_s24 + $0x28] sm:$0xff] }
 0x944   : > { %2232 = vmatpush.bf16.msra.mxu1 %v2866_v49 }
 0x945   : > { %v1929_v37 = vmul.f32 %v1925_v33, %v1921_v34 }
 0x947   : > { %v3588_v39 = vadd.f32 %v2934_v9, %v1929_v37 }
 0x948   : > { %2233 = vmatpush.bf16.msra.mxu1 %v2865_v56 }
 0x949   : > { %v1938_v1 = vpack.c.bf16 %v3588_v39, %v3586_v38 }
 0x94b   : > { %2791 = vmatmul.msk.bf16.gmra.mxu0 %vm940_vm1, %v1938_v1 }
 0x94c   : > { %2234 = vmatpush.bf16.msra.mxu1 %v2864_v3 }
 0x950   : > { %2235 = vmatpush.bf16.msra.mxu1 %v2863_v11 }
 0x954   : > { %2236 = vmatpush.bf16.msra.mxu1 %v2862_v19 }
 0x958   : > { %2237 = vmatpush.bf16.msra.mxu1 %v2861_v27 }
 0x9af   : > { %v1974_v12 = vpop.f32.mrf.mxu0 }
 0x9b0   : > { %v3601_v40 = vadd.f32 %v3598_v7, %v1974_v12 }
 0x9b2   : > { %v3605_v42 = vmul.f32 0.70710677, %v3601_v40 }
 0x9b4   : > { %v1992_v61 = vmul.f32 %v3605_v42, %v3605_v42 }
 0x9b6   : > { %v3610_v44 = vmin.f32 %v1992_v61, 16.0 }
 0x9b7   : > { %v1976_v45 = vpop.f32.mrf.mxu0 }
 0x9b8   : > { %v1994_v46 = vmul.f32 2.1237322e-06, %v3610_v44  ;;  %v2005_v47 = vmul.f32 3.8918573e-05, %v3610_v44  ;;  %v3615_v48 = vadd.f32 %v3598_v7, %v1976_v45 }
 0x9ba   : > { %v1995_v50 = vadd.f32 0.00028619796, %v1994_v46  ;;  %v2006_v52 = vadd.f32 0.001143296, %v2005_v47  ;;  %v3619_v53 = vmul.f32 0.70710677, %v3615_v48 }
 0x9bc   : > { %v2007_v54 = vmul.f32 %v2006_v52, %v3610_v44  ;;  %v2032_v55 = vmul.f32 %v3619_v53, %v3619_v53  ;;  %v1996_v58 = vmul.f32 %v1995_v50, %v3610_v44 }
 0x9be   : > { %v2008_v59 = vadd.f32 0.014752088, %v2007_v54  ;;  %v3626_v63 = vmin.f32 %v2032_v55, 16.0  ;;  %v1997_v4 = vadd.f32 0.0036580483, %v1996_v58 }
 0x9c0   : > { %v2009_v57 = vmul.f32 %v2008_v59, %v3610_v44  ;;  %v2034_v0 = vmul.f32 2.1237322e-06, %v3626_v63  ;;  %v2045_v2 = vmul.f32 3.8918573e-05, %v3626_v63  ;;  %v1998_v13 = vmul.f32 %v1997_v4, %v3610_v44 }
 0x9c2   : > { %v2010_v5 = vadd.f32 0.112945676, %v2009_v57  ;;  %v2035_v35 = vadd.f32 0.00028619796, %v2034_v0  ;;  %v2046_v6 = vadd.f32 0.001143296, %v2045_v2 }
 0x9c3   : > { %v1999_v20 = vadd.f32 0.05243302, %v1998_v13 }
 0x9c4   : > { %v2011_v8 = vmul.f32 %v2010_v5, %v3610_v44  ;;  %v2036_v9 = vmul.f32 %v2035_v35, %v3626_v63  ;;  %v2047_v10 = vmul.f32 %v2046_v6, %v3626_v63 }
 0x9c5   : > { %v2000_v28 = vmul.f32 %v1999_v20, %v3610_v44 }
 0x9c6   : > { %v2012_v14 = vadd.f32 0.4994258, %v2011_v8  ;;  %v2037_v16 = vadd.f32 0.0036580483, %v2036_v9  ;;  %v2048_v62 = vadd.f32 0.014752088, %v2047_v10 }
 0x9c7   : > { %v2001_v12 = vadd.f32 0.18741608, %v2000_v28 }
 0x9c8   : > { %v2013_v17 = vmul.f32 %v2012_v14, %v3610_v44  ;;  %v1979_v60 = vpop.f32.mrf.mxu0  ;;  %v2049_v29 = vmul.f32 %v2048_v62, %v3626_v63  ;;  %v2038_v23 = vmul.f32 %v2037_v16, %v3626_v63 }
 0x9c9   : > { %v3640_v18 = vadd.f32 %v3598_v7, %v1979_v60  ;;  %v2002_v49 = vmul.f32 %v2001_v12, %v3610_v44 }
 0x9ca   : > { %v2014_v22 = vadd.f32 1.0, %v2013_v17  ;;  %v2050_v24 = vadd.f32 0.112945676, %v2049_v29  ;;  %v2039_v30 = vadd.f32 0.05243302, %v2038_v23 }
 0x9cb   : > { %v3646_v26 = vmul.f32 0.70710677, %v3640_v18  ;;  %v2003_v3 = vadd.f32 1.1283791, %v2002_v49 }
 0x9cc   : > { %3013 = vrcp.f32 %v2014_v22  ;;  %v2051_v25 = vmul.f32 %v2050_v24, %v3626_v63  ;;  %v2040_v41 = vmul.f32 %v2039_v30, %v3626_v63  ;;  %v2026_v55 = vand.u32 2147483648, %v2014_v22 }
 0x9cd   : > { %v2072_v32 = vmul.f32 %v3646_v26, %v3646_v26  ;;  %v2024_v58 = vand.u32 2147483647, %v2014_v22  ;;  %vm2020_vm5 = vweird.f32 %v2014_v22  ;;  %v2004_v17 = vmul.f32 %v2003_v3, %v3605_v42 }
 0x9ce   : > { %v2052_v31 = vadd.f32 0.4994258, %v2051_v25  ;;  %v2041_v50 = vadd.f32 0.18741608, %v2040_v41  ;;  %v2027_v8 = vor.u32 1.1754944e-38, %v2026_v55  ;;  %v1984_v55 = vmul.f32 0.5, %v3601_v40 }
 0x9cf   : > { %v3653_v36 = vmin.f32 %v2072_v32, 16.0  ;;  %vm2025_vm7 = vcmp.eq.f32.partialorder %v2024_v58, 8.507059e+37 }
 0x9d0   : > { %v1981_v33 = vpop.f32.mrf.mxu0  ;;  %v2053_v34 = vmul.f32 %v2052_v31, %v3626_v63  ;;  %v2042_v44 = vmul.f32 %v2041_v50, %v3626_v63 }
 0x9d1   : > { %v3656_v37 = vadd.f32 %v3598_v7, %v1981_v33  ;;  %v2074_v45 = vmul.f32 2.1237322e-06, %v3653_v36  ;;  %v2085_v56 = vmul.f32 3.8918573e-05, %v3653_v36 }
 0x9d2   : > { %v3014_v1 = vpop.eup %3013  ;;  %v2054_v43 = vadd.f32 1.0, %v2053_v34  ;;  %v2043_v60 = vadd.f32 1.1283791, %v2042_v44 }
 0x9d3   : > { %v2016_v61 = vmul.f32 %v3014_v1, %v2014_v22  ;;  %v3661_v46 = vmul.f32 0.70710677, %v3656_v37  ;;  %v2075_v52 = vadd.f32 0.00028619796, %v2074_v45  ;;  %vm2021_vm4 = vweird.f32 %v3014_v1 }
 0x9d4   : > { %3015 = vrcp.f32 %v2054_v43  ;;  %v2086_v2 = vadd.f32 0.001143296, %v2085_v56  ;;  %vm2022_vm6 = vmor %vm2020_vm5, %vm2021_vm4  ;;  %v2066_v29 = vand.u32 2147483648, %v2054_v43  ;;  %v2064_v25 = vand.u32 2147483647, %v2054_v43 }
 0x9d5   : > { %v2017_v47 = vsub.f32 1.0, %v2016_v61  ;;  %v2112_v7 = vmul.f32 %v3661_v46, %v3661_v46  ;;  %v2076_v59 = vmul.f32 %v2075_v52, %v3653_v36  ;;  %vm2060_vm9 = vweird.f32 %v2054_v43 }
 0x9d6   : > { %v2087_v9 = vmul.f32 %v2086_v2, %v3653_v36  ;;  %v2044_v32 = vmul.f32 %v2043_v60, %v3619_v53  ;;  %v2067_v33 = vor.u32 1.1754944e-38, %v2066_v29  ;;  %vm2065_vm11 = vcmp.eq.f32.partialorder %v2064_v25, 8.507059e+37 }
 0x9d7   : > { %v2018_v54 = vmul.f32 %v3014_v1, %v2017_v47  ;;  %v3668_v57 = vmin.f32 %v2112_v7, 16.0  ;;  %v2077_v11 = vadd.f32 0.0036580483, %v2076_v59  ;;  %v1985_v59 = vmul.f32 0.5, %v3615_v48 }
 0x9d8   : > { %v2088_v16 = vadd.f32 0.014752088, %v2087_v9 }
 0x9d9   : > { %v2019_v0 = vadd.f32 %v3014_v1, %v2018_v54  ;;  %v2114_v4 = vmul.f32 2.1237322e-06, %v3668_v57  ;;  %v2125_v5 = vmul.f32 3.8918573e-05, %v3668_v57  ;;  %v2078_v27 = vmul.f32 %v2077_v11, %v3653_v36 }
 0x9da   : > { %v3016_v35 = vpop.eup %3015  ;;  %v2089_v20 = vmul.f32 %v2088_v16, %v3653_v36 }
 0x9db   : > { %v2023_v6 = vsel %vm2022_vm6, %v3014_v1, %v2019_v0  ;;  %v2056_v10 = vmul.f32 %v3016_v35, %v2054_v43  ;;  %v2115_v14 = vadd.f32 0.00028619796, %v2114_v4  ;;  %v2126_v62 = vadd.f32 0.001143296, %v2125_v5 }
 0x9dc   : > { %v2028_v13 = vsel %vm2025_vm7, %v2027_v8, %v2023_v6  ;;  %vm2061_vm8 = vweird.f32 %v3016_v35  ;;  %v2090_v28 = vadd.f32 0.112945676, %v2089_v20  ;;  %v2079_v45 = vadd.f32 0.05243302, %v2078_v27 }
 0x9dd   : > { %v2057_v63 = vsub.f32 1.0, %v2056_v10  ;;  %v2116_v19 = vmul.f32 %v2115_v14, %v3668_v57  ;;  %v2127_v22 = vmul.f32 %v2126_v62, %v3668_v57  ;;  %v2029_v23 = vmul.f32 %v2028_v13, %v2004_v17  ;;  %vm2062_vm10 = vmor %vm2060_vm9, %vm2061_vm8 }
 0x9de   : > { %v2091_v34 = vmul.f32 %v2090_v28, %v3653_v36  ;;  %v2080_v56 = vmul.f32 %v2079_v45, %v3653_v36  ;;  %v1987_v45 = vmul.f32 0.5, %v3656_v37 }
 0x9df   : > { %v2058_v24 = vmul.f32 %v3016_v35, %v2057_v63  ;;  %v2117_v31 = vadd.f32 0.0036580483, %v2116_v19  ;;  %v2128_v42 = vadd.f32 0.014752088, %v2127_v22  ;;  %v2792_v1 = vclamps-f32 %v2029_v23, 1.0 }
 0x9e0   : > { %v2092_v47 = vadd.f32 0.4994258, %v2091_v34 }
 0x9e1   : > { %v2059_v30 = vadd.f32 %v3016_v35, %v2058_v24  ;;  %v2129_v41 = vmul.f32 %v2128_v42, %v3668_v57  ;;  %v2118_v50 = vmul.f32 %v2117_v31, %v3668_v57  ;;  %v2152_v7 = vadd.f32 1.0, %v2792_v1 }
 0x9e2   : > { %v2093_v52 = vmul.f32 %v2092_v47, %v3653_v36 }
 0x9e3   : > { %v2063_v12 = vsel %vm2062_vm10, %v3016_v35, %v2059_v30  ;;  %v2130_v43 = vadd.f32 0.112945676, %v2129_v41  ;;  %v2119_v2 = vadd.f32 0.05243302, %v2118_v50  ;;  %v2156_v44 = vmul.f32 %v2152_v7, %v1984_v55 }
 0x9e4   : > { %v2068_v61 = vsel %vm2065_vm11, %v2067_v33, %v2063_v12  ;;  %v2094_v58 = vadd.f32 1.0, %v2093_v52  ;;  %v2081_v35 = vadd.f32 0.18741608, %v2080_v56 }
 0x9e5   : > { %v2069_v49 = vmul.f32 %v2068_v61, %v2044_v32  ;;  %v2131_v54 = vmul.f32 %v2130_v43, %v3668_v57  ;;  %v2120_v8 = vmul.f32 %v2119_v2, %v3668_v57  ;;  %v1986_v61 = vmul.f32 0.5, %v3640_v18 }
 0x9e6   : > { %3017 = vrcp.f32 %v2094_v58  ;;  %v2082_v10 = vmul.f32 %v2081_v35, %v3653_v36  ;;  %v2106_v16 = vand.u32 2147483648, %v2094_v58  ;;  %v2104_v63 = vand.u32 2147483647, %v2094_v58 }
 0x9e7   : > { %v2793_v53 = vclamps-f32 %v2069_v49, 1.0  ;;  %v2132_v3 = vadd.f32 0.4994258, %v2131_v54  ;;  %v2121_v11 = vadd.f32 0.18741608, %v2120_v8  ;;  %vm2100_vm13 = vweird.f32 %v2094_v58 }
 0x9e8   : > { %v2083_v14 = vadd.f32 1.1283791, %v2082_v10  ;;  %v2107_v22 = vor.u32 1.1754944e-38, %v2106_v16  ;;  %vm2105_vm15 = vcmp.eq.f32.partialorder %v2104_v63, 8.507059e+37 }
 0x9e9   : > { %v2153_v0 = vadd.f32 1.0, %v2793_v53  ;;  %v2133_v5 = vmul.f32 %v2132_v3, %v3668_v57  ;;  %v2122_v17 = vmul.f32 %v2121_v11, %v3668_v57 }
 0x9ea   : > { %v2084_v20 = vmul.f32 %v2083_v14, %v3646_v26 }
 0x9eb   : > { %v2157_v4 = vmul.f32 %v2153_v0, %v1985_v59  ;;  %v2134_v9 = vadd.f32 1.0, %v2133_v5  ;;  %v2123_v36 = vadd.f32 1.1283791, %v2122_v17 }
 0x9ec   : > { %v3018_v40 = vpop.eup %3017 }
 0x9ed   : > { %v2160_v6 = vpack.c.bf16 %v2157_v4, %v2156_v44  ;;  %3019 = vrcp.f32 %v2134_v9  ;;  %v2096_v48 = vmul.f32 %v3018_v40, %v2094_v58  ;;  %vm2101_vm12 = vweird.f32 %v3018_v40 }
 0x9ee   : > { %vm2102_vm14 = vmor %vm2100_vm13, %vm2101_vm12  ;;  %v2146_v25 = vand.u32 2147483648, %v2134_v9  ;;  %v2144_v30 = vand.u32 2147483647, %v2134_v9  ;;  %vm2140_vm2 = vweird.f32 %v2134_v9  ;;  %v2124_v32 = vmul.f32 %v2123_v36, %v3661_v46  ;;  %v2936_v46 = vld [vmem:[%s829_s20] ss:$0 sm:$0xff] }
 0x9ef   : > { %2238 = vmatmul.bf16.vlgmr.msra.gmra.mxu1 %v2160_v6  ;;  %v2097_v13 = vsub.f32 1.0, %v2096_v48  ;;  %v3742_v36 = vld [vmem:[%s841_s26] ss:$0 sm:$0xff] }
 0x9f0   : > { %v2147_v42 = vor.u32 1.1754944e-38, %v2146_v25  ;;  %vm2145_vm4 = vcmp.eq.f32.partialorder %v2144_v30, 8.507059e+37 }
 0x9f1   : > { %v2098_v60 = vmul.f32 %v3018_v40, %v2097_v13 }
 0x9f3   : > { %v3020_v62 = vpop.eup %3019  ;;  %v2099_v19 = vadd.f32 %v3018_v40, %v2098_v60 }
 0x9f4   : > { %v2136_v29 = vmul.f32 %v3020_v62, %v2134_v9  ;;  %vm2141_vm0 = vweird.f32 %v3020_v62 }
 0x9f5   : > { %v2103_v24 = vsel %vm2102_vm14, %v3018_v40, %v2099_v19  ;;  %vm2142_vm3 = vmor %vm2140_vm2, %vm2141_vm0  ;;  %v3735_v19 = vld [vmem:[%s838_s3] ss:$0 sm:$0xff]  ;;  %s3873_s3 = sld [smem:[#allocation23_spill]] (!%p2828_p9) }
 0x9f6   : > { %v2137_v23 = vsub.f32 1.0, %v2136_v29  ;;  %v2108_v27 = vsel %vm2105_vm15, %v2107_v22, %v2103_v24 }
 0x9f7   : > { %v2109_v57 = vmul.f32 %v2108_v27, %v2084_v20 }
 0x9f8   : > { %v2138_v28 = vmul.f32 %v3020_v62, %v2137_v23 }
 0x9f9   : > { %v2794_v26 = vclamps-f32 %v2109_v57, 1.0 }
 0x9fa   : > { %v2139_v31 = vadd.f32 %v3020_v62, %v2138_v28 }
 0x9fb   : > { %v2154_v41 = vadd.f32 1.0, %v2794_v26 }
 0x9fc   : > { %v2143_v33 = vsel %vm2142_vm3, %v3020_v62, %v2139_v31 }
 0x9fd   : > { %v2148_v34 = vsel %vm2145_vm4, %v2147_v42, %v2143_v33  ;;  %v2158_v49 = vmul.f32 %v2154_v41, %v1986_v61 }
 0x9fe   : > { %v2149_v1 = vmul.f32 %v2148_v34, %v2124_v32 }
 0xa00   : > { %v2795_v12 = vclamps-f32 %v2149_v1, 1.0 }
 0xa02   : > { %v2155_v47 = vadd.f32 1.0, %v2795_v12 }
 0xa04   : > { %v2159_v50 = vmul.f32 %v2155_v47, %v1987_v45 }
 0xa06   : > { %v2161_v43 = vpack.c.bf16 %v2159_v50, %v2158_v49 }
 0xa08   : > { %2243 = vmatmul.bf16.gmra.mxu1 %v2161_v43 }
 0xa6c   : > { %v2239_v52 = vpop.f32.mrf.mxu1 }
 0xa6d   : > { %v2240_v7 = vadd.f32 %v2936_v46, %v2239_v52 }
 0xa6f   : > { %v2249_v53 = vadd.f32 %v2240_v7, %v3576_v15 }
 0xa71   : > { %v2255_v54 = vsel %vm940_vm1, %v2249_v53, 0.0  ;;  %v2271_v55 = vmul.f32 %v2249_v53, %v2249_v53 }
 0xa72   : > { %2256 = vadd.xlane.f32.xlu2 %v2255_v54 }
 0xa73   : > { %v2275_v18 = vsel %vm940_vm1, %v2271_v55, 0.0 }
 0xa74   : > { %v2241_v37 = vpop.f32.mrf.mxu1  ;;  %2276 = vadd.xlane.f32.xlu1 %v2275_v18 }
 0xa75   : > { %v2242_v56 = vadd.f32 %v2936_v46, %v2241_v37 }
 0xa77   : > { %v3705_v58 = vadd.f32 %v2242_v56, %v3578_v51 }
 0xa79   : > { %v2258_v59 = vsel %vm940_vm1, %v3705_v58, 0.0  ;;  %v2272_v5 = vmul.f32 %v3705_v58, %v3705_v58 }
 0xa7b   : > { %v2278_v35 = vsel %vm940_vm1, %v2272_v5, 0.0 }
 0xa7c   : > { %2259 = vadd.xlane.f32.xlu1 %v2258_v59 }
 0xa85   : > { %v2244_v0 = vpop.f32.mrf.mxu1 }
 0xa86   : > { %v2245_v2 = vadd.f32 %v2936_v46, %v2244_v0 }
 0xa88   : > { %v3710_v15 = vadd.f32 %v2245_v2, %v3586_v38 }
 0xa8a   : > { %v2261_v3 = vsel %vm940_vm1, %v3710_v15, 0.0  ;;  %v2273_v9 = vmul.f32 %v3710_v15, %v3710_v15 }
 0xa8b   : > { %2262 = vadd.xlane.f32.xlu0 %v2261_v3 }
 0xa8c   : > { %v2281_v40 = vsel %vm940_vm1, %v2273_v9, 0.0 }
 0xa8d   : > { %v2246_v44 = vpop.f32.mrf.mxu1 }
 0xa8e   : > { %v2247_v4 = vadd.f32 %v2936_v46, %v2246_v44 }
 0xa90   : > { %v3717_v51 = vadd.f32 %v2247_v4, %v3588_v39 }
 0xa92   : > { %v2264_v6 = vsel %vm940_vm1, %v3717_v51, 0.0  ;;  %v2274_v38 = vmul.f32 %v3717_v51, %v3717_v51 }
 0xa93   : > { %2279 = vadd.xlane.f32.xlu0 %v2278_v35  ;;  %2265 = vadd.xlane.f32.xlu2 %v2264_v6 }
 0xa94   : > { %v2284_v8 = vsel %vm940_vm1, %v2274_v38, 0.0 }
 0xa95   : > { %2285 = vadd.xlane.f32.xlu1 %v2284_v8 }
 0xa9b   : > { %2282 = vadd.xlane.f32.xlu2 %v2281_v40 }
 0xae5   : > { %v2257_v39 = vpop.xlane.xlu2 %2256 }
 0xae6   : > { %v2267_v10 = vmul.f32 %v2257_v39, %v3548_v21 }
 0xae7   : > { %v2277_v11 = vpop.xlane.xlu1 %2276 }
 0xae8   : > { %v2291_v48 = vmul.f32 %v2267_v10, %v2267_v10  ;;  %v2287_v13 = vmul.f32 %v2277_v11, %v3548_v21  ;;  %v2350_v23 = vsub.f32 %v2249_v53, %v2267_v10 }
 0xaea   : > { %v2295_v14 = vsub.f32 %v2287_v13, %v2291_v48 }
 0xaec   : > { %v2299_v16 = vadd.f32 1e-05, %v2295_v14 }
 0xaee   : > { %3021 = vrsqrt.f32 %v2299_v16  ;;  %vm2309_vm6 = vweird.f32 %v2299_v16 }
 0xaef   : > { %v2260_v28 = vpop.xlane.xlu1 %2259 }
 0xaf0   : > { %v2268_v57 = vmul.f32 %v2260_v28, %v3548_v21 }
 0xaf2   : > { %v2292_v32 = vmul.f32 %v2268_v57, %v2268_v57  ;;  %v2351_v8 = vsub.f32 %v3705_v58, %v2268_v57 }
 0xaf4   : > { %v3022_v62 = vpop.eup %3021 }
 0xaf5   : > { %v2304_v17 = vmul.f32 %v3022_v62, %v2299_v16  ;;  %vm2310_vm5 = vweird.f32 %v3022_v62 }
 0xaf6   : > { %vm2311_vm7 = vmor %vm2309_vm6, %vm2310_vm5 }
 0xaf7   : > { %v2305_v60 = vmul.f32 %v3022_v62, %v2304_v17 }
 0xaf9   : > { %v2306_v63 = vmul.f32 0.5, %v2305_v60 }
 0xafb   : > { %v2307_v29 = vsub.f32 1.5, %v2306_v63 }
 0xafd   : > { %v2308_v20 = vmul.f32 %v3022_v62, %v2307_v29 }
 0xafe   : > { %v2263_v25 = vpop.xlane.xlu0 %2262 }
 0xaff   : > { %v2312_v22 = vsel %vm2311_vm7, %v3022_v62, %v2308_v20  ;;  %v2269_v61 = vmul.f32 %v2263_v25, %v3548_v21 }
 0xb00   : > { %v2346_v24 = vmul.f32 %v3735_v19, %v2312_v22 }
 0xb01   : > { %v2293_v43 = vmul.f32 %v2269_v61, %v2269_v61 }
 0xb02   : > { %v2354_v27 = vmul.f32 %v2350_v23, %v2346_v24 }
 0xb04   : > { %v2361_v30 = vadd.f32 %v3742_v36, %v2354_v27 }
 0xb06   : > { %2365 = vst.msk [vmem:[#allocation2] sm:$0xff] %vm940_vm1, %v2361_v30  ;;  %v2280_v31 = vpop.xlane.xlu0 %2279  ;;  %v2266_v42 = vpop.xlane.xlu2 %2265 }
 0xb07   : > { %v2288_v26 = vmul.f32 %v2280_v31, %v3548_v21  ;;  %v2270_v33 = vmul.f32 %v2266_v42, %v3548_v21 }
 0xb08   : > { %v2286_v34 = vpop.xlane.xlu1 %2285 }
 0xb09   : > { %v2296_v1 = vsub.f32 %v2288_v26, %v2292_v32  ;;  %v2294_v12 = vmul.f32 %v2270_v33, %v2270_v33  ;;  %v2290_v41 = vmul.f32 %v2286_v34, %v3548_v21  ;;  %v2353_v11 = vsub.f32 %v3717_v51, %v2270_v33 }
 0xb0a   : > { %v2352_v51 = vsub.f32 %v3710_v15, %v2269_v61 }
 0xb0b   : > { %v2300_v45 = vadd.f32 1e-05, %v2296_v1  ;;  %v2298_v47 = vsub.f32 %v2290_v41, %v2294_v12 }
 0xb0d   : > { %3023 = vrsqrt.f32 %v2300_v45  ;;  %v2302_v49 = vadd.f32 1e-05, %v2298_v47  ;;  %vm2319_vm9 = vweird.f32 %v2300_v45 }
 0xb0e   : > { %v2283_v50 = vpop.xlane.xlu2 %2282 }
 0xb0f   : > { %3025 = vrsqrt.f32 %v2302_v49  ;;  %v2289_v46 = vmul.f32 %v2283_v50, %v3548_v21  ;;  %vm2339_vm12 = vweird.f32 %v2302_v49 }
 0xb11   : > { %v2297_v52 = vsub.f32 %v2289_v46, %v2293_v43 }
 0xb13   : > { %v3024_v7 = vpop.eup %3023  ;;  %v2301_v53 = vadd.f32 1e-05, %v2297_v52 }
 0xb14   : > { %v2314_v54 = vmul.f32 %v3024_v7, %v2300_v45  ;;  %vm2320_vm8 = vweird.f32 %v3024_v7 }
 0xb15   : > { %v3026_v55 = vpop.eup %3025  ;;  %3027 = vrsqrt.f32 %v2301_v53  ;;  %vm2321_vm11 = vmor %vm2319_vm9, %vm2320_vm8  ;;  %vm2329_vm15 = vweird.f32 %v2301_v53 }
 0xb16   : > { %v2315_v18 = vmul.f32 %v3024_v7, %v2314_v54  ;;  %v2334_v37 = vmul.f32 %v3026_v55, %v2302_v49  ;;  %vm2340_vm10 = vweird.f32 %v3026_v55 }
 0xb17   : > { %vm2341_vm13 = vmor %vm2339_vm12, %vm2340_vm10 }
 0xb18   : > { %v2316_v56 = vmul.f32 0.5, %v2315_v18  ;;  %v2335_v59 = vmul.f32 %v3026_v55, %v2334_v37 }
 0xb1a   : > { %v2317_v0 = vsub.f32 1.5, %v2316_v56  ;;  %v2336_v2 = vmul.f32 0.5, %v2335_v59 }
 0xb1b   : > { %v3028_v3 = vpop.eup %3027 }
 0xb1c   : > { %v2318_v44 = vmul.f32 %v3024_v7, %v2317_v0  ;;  %v2337_v4 = vsub.f32 1.5, %v2336_v2  ;;  %v2324_v5 = vmul.f32 %v3028_v3, %v2301_v53  ;;  %vm2330_vm14 = vweird.f32 %v3028_v3 }
 0xb1d   : > { %vm2331_vm0 = vmor %vm2329_vm15, %vm2330_vm14 }
 0xb1e   : > { %v2322_v35 = vsel %vm2321_vm11, %v3024_v7, %v2318_v44  ;;  %v2338_v6 = vmul.f32 %v3026_v55, %v2337_v4  ;;  %v2325_v38 = vmul.f32 %v3028_v3, %v2324_v5 }
 0xb1f   : > { %v2347_v9 = vmul.f32 %v3735_v19, %v2322_v35 }
 0xb20   : > { %v2342_v40 = vsel %vm2341_vm13, %v3026_v55, %v2338_v6  ;;  %v2326_v39 = vmul.f32 0.5, %v2325_v38 }
 0xb21   : > { %v2355_v10 = vmul.f32 %v2351_v8, %v2347_v9  ;;  %v2349_v48 = vmul.f32 %v3735_v19, %v2342_v40 }
 0xb22   : > { %v2327_v13 = vsub.f32 1.5, %v2326_v39 }
 0xb23   : > { %v3758_v14 = vadd.f32 %v3742_v36, %v2355_v10  ;;  %v2357_v16 = vmul.f32 %v2353_v11, %v2349_v48 }
 0xb24   : > { %v2328_v62 = vmul.f32 %v3028_v3, %v2327_v13 }
 0xb25   : > { %2366 = vst.msk [vmem:[#allocation2 + $0x8] sm:$0xff] %vm940_vm1, %v3758_v14  ;;  %v3763_v58 = vadd.f32 %v3742_v36, %v2357_v16 }
 0xb26   : > { %v2332_v17 = vsel %vm2331_vm0, %v3028_v3, %v2328_v62 }
 0xb27   : > { %2368 = vst.msk [vmem:[#allocation2 + $0x18] sm:$0xff] %vm940_vm1, %v3763_v58  ;;  %v2348_v60 = vmul.f32 %v3735_v19, %v2332_v17 }
 0xb29   : > { %v2356_v63 = vmul.f32 %v2352_v51, %v2348_v60  ;;  %2372 = sbr.rel (%p2828_p9) target bundleno = 3155 (0xc53), region = 112 }
 0xb2b   : > { %v2363_v29 = vadd.f32 %v3742_v36, %v2356_v63 }
 0xb2d   : > { %2367 = vst.msk [vmem:[#allocation2 + $0x10] sm:$0xff] %vm940_vm1, %v2363_v29 }
 0xb2e   : > { %v2375_v20 = vsel %vm940_vm1, %v3758_v14, 0.0  ;;  %v2383_v22 = vmul.f32 %v3758_v14, %v3758_v14  ;;  %v2384_v19 = vmul.f32 %v3763_v58, %v3763_v58  ;;  %v2378_v23 = vsel %vm940_vm1, %v3763_v58, 0.0  ;;  %v2870_v24 = vld [vmem:[%s3873_s3 + $0x8] sm:$0xff]  ;;  %v2869_v25 = vld [vmem:[%s3873_s3] sm:$0xff] }
 0xb2f   : > { %2376 = vadd.xlane.f32.xlu0 %v2375_v20  ;;  %2463 = vmatpush.bf16.msra.mxu0 %v2870_v24  ;;  %v3033_v52 = vld [vmem:[%s3874_s16] ss:$0 sm:$0xff] }
 0xb30   : > { %v2385_v15 = vsel %vm940_vm1, %v2383_v22, 0.0  ;;  %v2388_v36 = vsel %vm940_vm1, %v2384_v19, 0.0  ;;  %2481 = vmatpush.bf16.msra.mxu1 %v2870_v24  ;;  %v3034_v37 = vld [vmem:[%s3875_s25] ss:$0 sm:$0xff] }
 0xb31   : > { %2386 = vadd.xlane.f32.xlu1 %v2385_v15  ;;  %v3035_v9 = vld [vmem:[%s3876_s27] ss:$0 sm:$0xff] }
 0xb33   : > { %2464 = vmatpush.bf16.msra.mxu0 %v2869_v25 }
 0xb34   : > { %2482 = vmatpush.bf16.msra.mxu1 %v2869_v25 }
 0xb37   : > { %2379 = vadd.xlane.f32.xlu0 %v2378_v23 }
 0xb39   : > { %2389 = vadd.xlane.f32.xlu1 %v2388_v36 }
 0xba2   : > { %v2377_v27 = vpop.xlane.xlu0 %2376 }
 0xba3   : > { %v2381_v28 = vmul.f32 %v2377_v27, %v3548_v21 }
 0xba4   : > { %v2387_v30 = vpop.xlane.xlu1 %2386 }
 0xba5   : > { %v2393_v57 = vmul.f32 %v2381_v28, %v2381_v28  ;;  %v2391_v31 = vmul.f32 %v2387_v30, %v3548_v21  ;;  %v2424_v55 = vsub.f32 %v3758_v14, %v2381_v28 }
 0xba7   : > { %v2395_v42 = vsub.f32 %v2391_v31, %v2393_v57 }
 0xba9   : > { %v2397_v32 = vadd.f32 1e-05, %v2395_v42 }
 0xbaa   : > { %v2380_v26 = vpop.xlane.xlu0 %2379 }
 0xbab   : > { %3036 = vrsqrt.f32 %v2397_v32  ;;  %v2382_v33 = vmul.f32 %v2380_v26, %v3548_v21  ;;  %vm2405_vm3 = vweird.f32 %v2397_v32 }
 0xbac   : > { %v2390_v34 = vpop.xlane.xlu1 %2389 }
 0xbad   : > { %v2394_v1 = vmul.f32 %v2382_v33, %v2382_v33  ;;  %v2392_v12 = vmul.f32 %v2390_v34, %v3548_v21  ;;  %v2425_v5 = vsub.f32 %v3763_v58, %v2382_v33 }
 0xbaf   : > { %v2396_v41 = vsub.f32 %v2392_v12, %v2394_v1 }
 0xbb1   : > { %v3037_v61 = vpop.eup %3036  ;;  %v2398_v45 = vadd.f32 1e-05, %v2396_v41 }
 0xbb2   : > { %v2400_v47 = vmul.f32 %v3037_v61, %v2397_v32  ;;  %vm2406_vm2 = vweird.f32 %v3037_v61 }
 0xbb3   : > { %3038 = vrsqrt.f32 %v2398_v45  ;;  %vm2407_vm4 = vmor %vm2405_vm3, %vm2406_vm2  ;;  %vm2415_vm6 = vweird.f32 %v2398_v45 }
 0xbb4   : > { %v2401_v49 = vmul.f32 %v3037_v61, %v2400_v47 }
 0xbb6   : > { %v2402_v50 = vmul.f32 0.5, %v2401_v49 }
 0xbb8   : > { %v2403_v43 = vsub.f32 1.5, %v2402_v50 }
 0xbb9   : > { %v3039_v46 = vpop.eup %3038 }
 0xbba   : > { %v2410_v7 = vmul.f32 %v3039_v46, %v2398_v45  ;;  %v2404_v53 = vmul.f32 %v3037_v61, %v2403_v43  ;;  %vm2416_vm5 = vweird.f32 %v3039_v46 }
 0xbbb   : > { %vm2417_vm7 = vmor %vm2415_vm6, %vm2416_vm5 }
 0xbbc   : > { %v2411_v54 = vmul.f32 %v3039_v46, %v2410_v7  ;;  %v2408_v21 = vsel %vm2407_vm4, %v3037_v61, %v2404_v53 }
 0xbbd   : > { %v2422_v18 = vmul.f32 %v3033_v52, %v2408_v21 }
 0xbbe   : > { %v2412_v56 = vmul.f32 0.5, %v2411_v54 }
 0xbbf   : > { %v2426_v59 = vmul.f32 %v2424_v55, %v2422_v18 }
 0xbc0   : > { %v2413_v0 = vsub.f32 1.5, %v2412_v56 }
 0xbc1   : > { %v2431_v2 = vadd.f32 %v3034_v37, %v2426_v59 }
 0xbc2   : > { %v2414_v3 = vmul.f32 %v3039_v46, %v2413_v0 }
 0xbc3   : > { %v2438_v44 = vpack.c.bf16 %v2431_v2, %v2431_v2 }
 0xbc4   : > { %v2418_v4 = vsel %vm2417_vm7, %v3039_v46, %v2414_v3 }
 0xbc5   : > { %2837 = vmatmul.msk.bf16.vlgmr.msra.gmra.mxu0 %vm940_vm1, %v2438_v44  ;;  %v2423_v35 = vmul.f32 %v3033_v52, %v2418_v4 }
 0xbc7   : > { %v2427_v6 = vmul.f32 %v2425_v5, %v2423_v35 }
 0xbc9   : > { %v2432_v38 = vadd.f32 %v3034_v37, %v2427_v6 }
 0xbcb   : > { %v2471_v8 = vpack.c.bf16 %v2432_v38, %v2432_v38 }
 0xbcd   : > { %2838 = vmatmul.msk.bf16.vlgmr.msra.gmra.mxu1 %vm940_vm1, %v2471_v8 }
 0xc42   : > { %v2466_v40 = vpop.f32.mrf.mxu0 }
 0xc43   : > { %v2467_v39 = vadd.f32 %v3035_v9, %v2466_v40 }
 0xc45   : > { %2470 = vst.msk [vmem:[#allocation8] sm:$0xff] %vm940_vm1, %v2467_v39 }
 0xc4a   : > { %v2468_v10 = vpop.f32.mrf.mxu0  ;;  %v2484_v11 = vpop.f32.mrf.mxu1 }
 0xc4b   : > { %v2485_v48 = vadd.f32 %v3035_v9, %v2484_v11 }
 0xc4d   : > { %2489 = vst.msk [vmem:[#allocation8 + $0x8] sm:$0xff] %vm940_vm1, %v2485_v48 }
 0xc52   : > { %v2486_v13 = vpop.f32.mrf.mxu1 }
 0xc53 PF: > { %s3877_s24 = sld [smem:[#allocation12_spill]]  ;;  %s3143_s1 = smov [#allocation8]  }
 0xc54   : > { %s3879_s19 = sld [smem:[#allocation25_spill]]  ;;  %s2498_s29 = sshll.u32 %s3143_s1, 4  ;;  %s2499_s29 = int_to_ptr.vmem [resolvable:$true] %s2498_s29 }
 0xc55   : > { %s3144_s26 = smov 128   ;;  %s3145_s30 = smov 8  }
 0xc59   : > { %s3878_s23 = sadd.s32 4294967295, %s3877_s24  }
 0xc5a   : > { %p2887_p10 = scmp.eq.s32.totalorder %s3878_s23, 1  ;;  %s2500_s28 = sshll.u32 %s3879_s19, 4  ;;  %s2501_s28 = int_to_ptr.hbm [resolvable:$true] %s2500_s28 }
 0xc5c   : > { %2878 = dma.vmem_to_hbm [thread:$0]  (%p2887_p10), %s2499_s29, 256, %s2501_s28, [#allocation7], %s3144_s26, %s3144_s26, %s3145_s30  }
 0xc5d   : > { %3115 = dma.done.wait (%p2887_p10), [#allocation7], 256  }
 0xc5e   : > { %3117 = vsyncadd (%p2887_p10), [#allocation7], 4294967040 }
 0xc5f PF: > { %s3880_s18 = sld [smem:[#allocation12_spill]] }
 0xc60   : > { %s3881_s1 = sld [smem:[#allocation11_spill]] }
 0xc61   : > { %s3882_s22 = sld [smem:[#allocation13_spill]] }
 0xc65   : > { %s32_s23 = sadd.s32 1, %s3880_s18  }
 0xc66   : > { %p29_p11 = scmp.ge.s32.totalorder %s32_s23, 4  }
 0xc68   :  { %31 = sbr.rel (!%p29_p11) target bundleno = 16 (0x10), region = 179 }
 0xc6d   :  { %2517 = vsyncpa [#allocation6], 1 }
 0xc6e   :  { %2519 = vsyncpa [#allocation6 + $0x1], 1 }
 0xc6f   :  { %2520 = vsyncpa [#allocation7], 1 }
 0xc70   :  { %2522 = vsyncpa [#allocation7 + $0x1], 1 }

</bundles_post_ra>
